<compile_context>
chip_gen: v5e
topology: v5e:2x2
jax: 0.10.0
libtpu: 0.0.40
codegen_flags: <defaults>
</compile_context>

<pallas_src>
import functools

import jax
import jax.numpy as jnp
from jax.experimental import pallas as pl
from jax.experimental.pallas import tpu as pltpu


def _bottleneck_kernel(x_hbm, w1_ref, b1_ref, w2_ref, b2_ref, w3_ref, b3_ref,
                       out_ref, xbuf, sem, *, H, W):
    # x_hbm:   (N, Hp+2, Wp, Cp) bf16, spatially + channel padded input, in HBM
    # w1_ref:  (Cp, Pp)          bf16, bn1 scale folded in
    # w2_ref:  (3, 3*Pp, Pp)     bf16, bn2 scale folded in, kw taps stacked on K
    # w3_ref:  (Pp, Cp)          bf16, bn3 scale folded in
    # bX_ref:  (1, C)            f32 folded BN biases
    # out_ref: (1, TR, Wp, Cp)   f32 (padded-width coordinates; col j == orig col j-1)
    # xbuf:    (2, TR+2, Wp, Cp) bf16 double-buffered halo slab
    # sem:     DMA semaphores, shape (2,)
    n = pl.program_id(0)
    rt = pl.program_id(1)
    n_rt = pl.num_programs(1)
    _, slab_rows, Wp, Cp = xbuf.shape
    TR = slab_rows - 2
    Pp = w1_ref.shape[1]

    slot = rt % 2

    def start_fetch(r, s):
        # rows [r*TR, r*TR + TR + 2) of padded image n -> slab buffer s
        pltpu.make_async_copy(x_hbm.at[n, pl.ds(r * TR, slab_rows)],
                              xbuf.at[s], sem.at[s]).start()

    # Prime the pipeline on the first row tile of this image.
    @pl.when(rt == 0)
    def _():
        start_fetch(0, 0)

    # Prefetch the next row tile (same image) into the other buffer.
    @pl.when(rt + 1 < n_rt)
    def _():
        start_fetch(rt + 1, 1 - slot)

    # Wait for the slab of the current row tile (issued here if rt==0,
    # otherwise issued during the previous grid step).
    pltpu.make_async_copy(x_hbm.at[n, pl.ds(rt * TR, slab_rows)],
                          xbuf.at[slot], sem.at[slot]).wait()

    x_slab = xbuf[slot]                                   # (TR+2, Wp, Cp) bf16
    xs = x_slab.reshape(slab_rows * Wp, Cp)

    # ---- conv1 (1x1) + bn1 bias + relu on the whole halo slab ----------------
    h1 = jnp.dot(xs, w1_ref[...], preferred_element_type=jnp.float32)
    h1 = jnp.maximum(h1 + b1_ref[...], 0.0).reshape(slab_rows, Wp, Pp)

    # Zero the conv2 padding ring / out-of-image rows (relu(bn1 bias) would
    # otherwise leak into it).  Mask built in-kernel from iota — no mask input.
    rid = jax.lax.broadcasted_iota(jnp.int32, (slab_rows, Wp, Pp), 0) + rt * TR
    cid = jax.lax.broadcasted_iota(jnp.int32, (slab_rows, Wp, Pp), 1)
    valid = (rid >= 1) & (rid <= H) & (cid >= 1) & (cid <= W)
    h1 = jnp.where(valid, h1, 0.0)

    # ---- conv2 (3x3, stride=1, dilation=1, pad=1) + bn2 bias + relu ----------
    # kw taps built with sublane rolls over the full Wp width (circular wrap is
    # safe: the wrapped columns are zero-masked pad columns).  3 matmuls (one
    # per kh) with the kw taps fused into a K = 3*Pp contraction, M = TR*Wp.
    taps = []
    for kw in range(3):
        t = h1 if kw == 1 else pltpu.roll(h1, (1 - kw) % Wp, axis=1)
        taps.append(t.astype(jnp.bfloat16))
    h1cat = jnp.concatenate(taps, axis=-1)                # (TR+2, Wp, 3*Pp) bf16

    acc = jnp.zeros((TR * Wp, Pp), jnp.float32)
    for kh in range(3):
        acc = acc + jnp.dot(h1cat[kh:kh + TR].reshape(TR * Wp, 3 * Pp),
                            w2_ref[kh], preferred_element_type=jnp.float32)
    h2 = jnp.maximum(acc + b2_ref[...], 0.0)

    # ---- conv3 (1x1) + bn3 bias ----------------------------------------------
    h3 = jnp.dot(h2.astype(jnp.bfloat16), w3_ref[...],
                 preferred_element_type=jnp.float32) + b3_ref[...]

    # ---- residual add (downsample=None) + relu --------------------------------
    # Pure leading-dim row slice (no column offset); upcast bf16 -> f32.
    res = x_slab[1:TR + 1].reshape(TR * Wp, Cp).astype(jnp.float32)
    out_ref[0] = jnp.maximum(h3 + res, 0.0).reshape(TR, Wp, Cp)


def _round_up(x, m):
    return (x + m - 1) // m * m


def bottleneck_forward(x_nchw, params, *, row_tile=8):
    """x_nchw: (N, Cin, H, W) float32, PyTorch layout. Returns (N, Cout, H, W)."""
    w1, s1, b1, w2, s2, b2, w3, s3, b3 = params
    N, Cin, H, W = x_nchw.shape
    planes = w1.shape[1]
    Cout = w3.shape[1]
    assert Cout == Cin, "downsample=None requires inplanes == planes * expansion"

    TR = row_tile                               # output rows per grid step
    n_rt = pl.cdiv(H, TR)                       # cdiv tiling; extra rows masked
    Hp = n_rt * TR
    Cp = _round_up(Cin, 128)                    # lane-dense channel padding
    Pp = _round_up(planes, 128)
    Wp = _round_up(W + 2, 8)                    # sublane-aligned padded width

    # NCHW -> NHWC; zero-pad 1 halo row on top, 1 + (Hp - H) rows on the bottom,
    # 1 halo col left (+ right alignment cols), channels to Cp; store in bf16.
    x = jnp.transpose(x_nchw, (0, 2, 3, 1)).astype(jnp.float32)
    x_pad = jnp.pad(x, ((0, 0), (1, 1 + Hp - H), (1, Wp - W - 1), (0, Cp - Cin)))
    x_pad = x_pad.astype(jnp.bfloat16)

    # Fold the BN scale into the conv weights (per output channel), pad the
    # channel dims to multiples of 128, cast weights to bf16 for the MXU.
    w1f = jnp.pad(w1 * s1, ((0, Cp - Cin), (0, Pp - planes))).astype(jnp.bfloat16)
    w2f = jnp.pad(w2 * s2, ((0, 0), (0, 0), (0, Pp - planes), (0, Pp - planes)))
    w2f = w2f.astype(jnp.bfloat16).reshape(3, 3 * Pp, Pp)      # kw stacked into K
    w3f = jnp.pad(w3 * s3, ((0, Pp - planes), (0, Cp - Cout))).astype(jnp.bfloat16)
    b1p = jnp.pad(b1, ((0, 0), (0, Pp - planes)))
    b2p = jnp.pad(b2, ((0, 0), (0, Pp - planes)))
    b3p = jnp.pad(b3, ((0, 0), (0, Cp - Cout)))

    kernel = functools.partial(_bottleneck_kernel, H=H, W=W)

    out = pl.pallas_call(
        kernel,
        out_shape=jax.ShapeDtypeStruct((N, Hp, Wp, Cp), jnp.float32),
        grid=(N, n_rt),
        in_specs=[
            pl.BlockSpec(memory_space=pl.ANY),                  # x_pad (manual DMA)
            # TODO(synk): on v7x, mark the constant weight/bias blocks with
            #             pipeline_mode=pl.Buffered(1) to reclaim ~half their VMEM.
            pl.BlockSpec(w1f.shape, lambda n, r: (0, 0)),
            pl.BlockSpec(b1p.shape, lambda n, r: (0, 0)),
            pl.BlockSpec(w2f.shape, lambda n, r: (0, 0, 0)),
            pl.BlockSpec(b2p.shape, lambda n, r: (0, 0)),
            pl.BlockSpec(w3f.shape, lambda n, r: (0, 0)),
            pl.BlockSpec(b3p.shape, lambda n, r: (0, 0)),
        ],
        out_specs=pl.BlockSpec((1, TR, Wp, Cp), lambda n, r: (n, r, 0, 0)),
        scratch_shapes=[
            pltpu.VMEM((2, TR + 2, Wp, Cp), jnp.bfloat16),      # double-buffered slab
            pltpu.SemaphoreType.DMA((2,)),
        ],
        compiler_params=pltpu.CompilerParams(
            # Row-tile axis is the sequential inner axis so the in-kernel
            # prefetch chain (rt -> rt+1 within one image) is well defined;
            # the batch axis is megacore-parallel.
            dimension_semantics=("parallel", "arbitrary"),
            # Generation-aware tuning: ~48 MiB is safe everywhere; re-derive
            # row_tile / limit per chip (raise toward ~100 MiB + larger TR on
            # v5e/v6e's 128 MiB VMEM, keep <= ~52-56 MiB on v7x's 64 MiB).
            vmem_limit_bytes=48 * 1024 * 1024,
        ),
    )(x_pad, w1f, b1p, w2f, b2p, w3f, b3p)

    # Drop padded rows, the halo/alignment columns, and padded channels.
    out = out[:, :H, 1:W + 1, :Cout]
    return jnp.transpose(out, (0, 3, 1, 2))                     # back to NCHW


def _fold_bn(gamma, beta, mean, var, eps=1e-5):
    scale = gamma / jnp.sqrt(var + eps)
    bias = beta - mean * scale
    return scale[None, :], bias[None, :]


def make_params(key, inplanes, planes):
    """Deterministic synthetic parameters (same shapes as the PyTorch module)."""
    ks = jax.random.split(key, 12)
    expansion = 4
    # conv weights generated directly in matmul-friendly layouts:
    # (Cin, Cout) for the 1x1 convs, (kh, kw, Cin, Cout) for the 3x3 conv.
    w1 = 0.1 * jax.random.normal(ks[0], (inplanes, planes), jnp.float32)
    w2 = 0.1 * jax.random.normal(ks[1], (3, 3, planes, planes), jnp.float32)
    w3 = 0.1 * jax.random.normal(ks[2], (planes, planes * expansion), jnp.float32)

    def bn_params(k, c):
        k1, k2, k3, k4 = jax.random.split(k, 4)
        gamma = 1.0 + 0.1 * jax.random.normal(k1, (c,), jnp.float32)
        beta = 0.1 * jax.random.normal(k2, (c,), jnp.float32)
        mean = 0.05 * jax.random.normal(k3, (c,), jnp.float32)
        var = 1.0 + 0.2 * jnp.abs(jax.random.normal(k4, (c,), jnp.float32))
        return _fold_bn(gamma, beta, mean, var)

    s1, b1 = bn_params(ks[3], planes)
    s2, b2 = bn_params(ks[4], planes)
    s3, b3 = bn_params(ks[5], planes * expansion)
    return (w1, s1, b1, w2, s2, b2, w3, s3, b3)


def bottleneck_reference(x_nchw, params):
    """Plain-JAX f32 reference (same math, no Pallas) for the correctness check."""
    w1, s1, b1, w2, s2, b2, w3, s3, b3 = params
    x = jnp.transpose(x_nchw, (0, 2, 3, 1)).astype(jnp.float32)
    h = jnp.maximum(jnp.einsum('nhwc,cd->nhwd', x, w1) * s1 + b1, 0.0)
    h = jax.lax.conv_general_dilated(
        h, w2, window_strides=(1, 1), padding=((1, 1), (1, 1)),
        dimension_numbers=('NHWC', 'HWIO', 'NHWC'))
    h = jnp.maximum(h * s2 + b2, 0.0)
    h = jnp.einsum('nhwc,cd->nhwd', h, w3) * s3 + b3
    out = jnp.maximum(h + x, 0.0)
    return jnp.transpose(out, (0, 3, 1, 2))


if __name__ == "__main__":
    key = jax.random.PRNGKey(0)
    kx, kp = jax.random.split(key)

    planes = 8
    inplanes = planes * 4      # 32, so the residual add works with downsample=None
    N, H, W = 2, 16, 16

    x = jax.random.normal(kx, (N, inplanes, H, W), jnp.float32)   # NCHW like PyTorch
    params = make_params(kp, inplanes, planes)

    out = bottleneck_forward(x, params)
    out = jax.block_until_ready(out)

    ref = bottleneck_reference(x, params)
    max_diff = float(jnp.max(jnp.abs(out - ref)))
    assert out.shape == (N, planes * 4, H, W)
    # bf16 input / bf16 MXU matmuls with f32 accumulation vs. pure-f32 reference
    # (the residual is now also bf16-rounded, so slightly looser than before).
    assert max_diff < 5e-2, f"mismatch vs reference: {max_diff}"

    print("KERNEL_OK")
</pallas_src>

<mosaic_0001>
module attributes {stable_mosaic.version = 11 : i64} {
  func.func @_bottleneck_kernel(%arg0: i32, %arg1: i32, %arg2: memref<2x18x24x128xbf16, #tpu.memory_space<any>>, %arg3: memref<128x128xbf16, #tpu.memory_space<vmem>>, %arg4: memref<1x128xf32, #tpu.memory_space<vmem>>, %arg5: memref<3x384x128xbf16, #tpu.memory_space<vmem>>, %arg6: memref<1x128xf32, #tpu.memory_space<vmem>>, %arg7: memref<128x128xbf16, #tpu.memory_space<vmem>>, %arg8: memref<1x128xf32, #tpu.memory_space<vmem>>, %arg9: memref<1x8x24x128xf32, #tpu.memory_space<vmem>>, %arg10: memref<2x10x24x128xbf16, #tpu.memory_space<vmem>>, %arg11: memref<2x!tpu.dma_semaphore, #tpu.memory_space<semaphore_mem>>) attributes {dimension_semantics = [#tpu.dimension_semantics<parallel>, #tpu.dimension_semantics<arbitrary>], iteration_bounds = array<i64: 2, 2>, scalar_prefetch = 0 : i64, scratch_operands = 2 : i64, tpu.core_type = #tpu.core_type<tc>, window_params = [{}, {pipeline_mode = #tpu.pipeline_mode<synchronous>, transform_indices = @transform_1, window_bounds = array<i64: 128, 128>}, {pipeline_mode = #tpu.pipeline_mode<synchronous>, transform_indices = @transform_2, window_bounds = array<i64: 1, 128>}, {pipeline_mode = #tpu.pipeline_mode<synchronous>, transform_indices = @transform_3, window_bounds = array<i64: 3, 384, 128>}, {pipeline_mode = #tpu.pipeline_mode<synchronous>, transform_indices = @transform_4, window_bounds = array<i64: 1, 128>}, {pipeline_mode = #tpu.pipeline_mode<synchronous>, transform_indices = @transform_5, window_bounds = array<i64: 128, 128>}, {pipeline_mode = #tpu.pipeline_mode<synchronous>, transform_indices = @transform_6, window_bounds = array<i64: 1, 128>}, {transform_indices = @transform_7, window_bounds = array<i64: 1, 8, 24, 128>}]} {
    %c2_i32 = arith.constant 2 : i32
    %c0_i32 = arith.constant 0 : i32
    %0 = arith.cmpi eq, %c2_i32, %c0_i32 : i32
    %c1_i32 = arith.constant 1 : i32
    %1 = arith.select %0, %c1_i32, %c2_i32 : i32
    %2 = arith.remsi %arg1, %1 : i32
    %c0_i32_0 = arith.constant 0 : i32
    %3 = arith.cmpi ne, %2, %c0_i32_0 : i32
    %c0_i32_1 = arith.constant 0 : i32
    %4 = arith.cmpi slt, %2, %c0_i32_1 : i32
    %c0_i32_2 = arith.constant 0 : i32
    %5 = arith.cmpi slt, %1, %c0_i32_2 : i32
    %6 = arith.xori %4, %5 : i1
    %7 = arith.andi %6, %3 : i1
    %8 = arith.addi %2, %1 : i32
    %9 = arith.select %7, %8, %2 : i32
    %c0_i32_3 = arith.constant 0 : i32
    %10 = arith.cmpi eq, %arg1, %c0_i32_3 : i32
    %11 = arith.extui %10 : i1 to i32
    %c0_i32_4 = arith.constant 0 : i32
    %12 = arith.cmpi ne, %11, %c0_i32_4 : i32
    scf.if %12 {
      %c0_i32_50 = arith.constant 0 : i32
      %c0_i32_51 = arith.constant 0 : i32
      %c0_i32_52 = arith.constant 0 : i32
      %c0_i32_53 = arith.constant 0 : i32
      %c0_i32_54 = arith.constant 0 : i32
      %100 = tpu.memref_slice %arg2[%arg0, %c0_i32_52, %c0_i32_53, %c0_i32_54] : memref<2x18x24x128xbf16, #tpu.memory_space<any>> -> memref<1x10x24x128xbf16, #tpu.memory_space<any>>
      %101 = tpu.memref_squeeze %100 : memref<1x10x24x128xbf16, #tpu.memory_space<any>> -> memref<10x24x128xbf16, #tpu.memory_space<any>>
      %c0_i32_55 = arith.constant 0 : i32
      %c0_i32_56 = arith.constant 0 : i32
      %c0_i32_57 = arith.constant 0 : i32
      %102 = tpu.memref_slice %arg10[%c0_i32_50, %c0_i32_55, %c0_i32_56, %c0_i32_57] : memref<2x10x24x128xbf16, #tpu.memory_space<vmem>> -> memref<1x10x24x128xbf16, #tpu.memory_space<vmem>>
      %103 = tpu.memref_squeeze %102 : memref<1x10x24x128xbf16, #tpu.memory_space<vmem>> -> memref<10x24x128xbf16, #tpu.memory_space<vmem>>
      %104 = tpu.memref_slice %arg11[%c0_i32_51] : memref<2x!tpu.dma_semaphore, #tpu.memory_space<semaphore_mem>> -> memref<1x!tpu.dma_semaphore, #tpu.memory_space<semaphore_mem>>
      %105 = tpu.memref_squeeze %104 : memref<1x!tpu.dma_semaphore, #tpu.memory_space<semaphore_mem>> -> memref<!tpu.dma_semaphore, #tpu.memory_space<semaphore_mem>>
      tpu.enqueue_dma source(%101 : memref<10x24x128xbf16, #tpu.memory_space<any>>) target(%103 : memref<10x24x128xbf16, #tpu.memory_space<vmem>>) target_semaphore(%105 : memref<!tpu.dma_semaphore, #tpu.memory_space<semaphore_mem>>)
    } else {
    }
    %c1_i32_5 = arith.constant 1 : i32
    %13 = arith.addi %arg1, %c1_i32_5 : i32
    %c2_i32_6 = arith.constant 2 : i32
    %14 = arith.cmpi slt, %13, %c2_i32_6 : i32
    %15 = arith.extui %14 : i1 to i32
    %c0_i32_7 = arith.constant 0 : i32
    %16 = arith.cmpi ne, %15, %c0_i32_7 : i32
    scf.if %16 {
      %c1_i32_50 = arith.constant 1 : i32
      %100 = arith.addi %arg1, %c1_i32_50 : i32
      %c1_i32_51 = arith.constant 1 : i32
      %101 = arith.subi %c1_i32_51, %9 : i32
      %c8_i32_52 = arith.constant 8 : i32
      %102 = arith.muli %100, %c8_i32_52 : i32
      %c0_i32_53 = arith.constant 0 : i32
      %c0_i32_54 = arith.constant 0 : i32
      %103 = tpu.memref_slice %arg2[%arg0, %102, %c0_i32_53, %c0_i32_54] : memref<2x18x24x128xbf16, #tpu.memory_space<any>> -> memref<1x10x24x128xbf16, #tpu.memory_space<any>>
      %104 = tpu.memref_squeeze %103 : memref<1x10x24x128xbf16, #tpu.memory_space<any>> -> memref<10x24x128xbf16, #tpu.memory_space<any>>
      %c0_i32_55 = arith.constant 0 : i32
      %c0_i32_56 = arith.constant 0 : i32
      %c0_i32_57 = arith.constant 0 : i32
      %105 = tpu.memref_slice %arg10[%101, %c0_i32_55, %c0_i32_56, %c0_i32_57] : memref<2x10x24x128xbf16, #tpu.memory_space<vmem>> -> memref<1x10x24x128xbf16, #tpu.memory_space<vmem>>
      %106 = tpu.memref_squeeze %105 : memref<1x10x24x128xbf16, #tpu.memory_space<vmem>> -> memref<10x24x128xbf16, #tpu.memory_space<vmem>>
      %107 = tpu.memref_slice %arg11[%101] : memref<2x!tpu.dma_semaphore, #tpu.memory_space<semaphore_mem>> -> memref<1x!tpu.dma_semaphore, #tpu.memory_space<semaphore_mem>>
      %108 = tpu.memref_squeeze %107 : memref<1x!tpu.dma_semaphore, #tpu.memory_space<semaphore_mem>> -> memref<!tpu.dma_semaphore, #tpu.memory_space<semaphore_mem>>
      tpu.enqueue_dma source(%104 : memref<10x24x128xbf16, #tpu.memory_space<any>>) target(%106 : memref<10x24x128xbf16, #tpu.memory_space<vmem>>) target_semaphore(%108 : memref<!tpu.dma_semaphore, #tpu.memory_space<semaphore_mem>>)
    } else {
    }
    %c8_i32 = arith.constant 8 : i32
    %17 = arith.muli %arg1, %c8_i32 : i32
    %c0_i32_8 = arith.constant 0 : i32
    %c0_i32_9 = arith.constant 0 : i32
    %18 = tpu.memref_slice %arg2[%arg0, %17, %c0_i32_8, %c0_i32_9] : memref<2x18x24x128xbf16, #tpu.memory_space<any>> -> memref<1x10x24x128xbf16, #tpu.memory_space<any>>
    %19 = tpu.memref_squeeze %18 : memref<1x10x24x128xbf16, #tpu.memory_space<any>> -> memref<10x24x128xbf16, #tpu.memory_space<any>>
    %c0_i32_10 = arith.constant 0 : i32
    %c0_i32_11 = arith.constant 0 : i32
    %c0_i32_12 = arith.constant 0 : i32
    %20 = tpu.memref_slice %arg10[%9, %c0_i32_10, %c0_i32_11, %c0_i32_12] : memref<2x10x24x128xbf16, #tpu.memory_space<vmem>> -> memref<1x10x24x128xbf16, #tpu.memory_space<vmem>>
    %21 = tpu.memref_squeeze %20 : memref<1x10x24x128xbf16, #tpu.memory_space<vmem>> -> memref<10x24x128xbf16, #tpu.memory_space<vmem>>
    %22 = tpu.memref_slice %arg11[%9] : memref<2x!tpu.dma_semaphore, #tpu.memory_space<semaphore_mem>> -> memref<1x!tpu.dma_semaphore, #tpu.memory_space<semaphore_mem>>
    %23 = tpu.memref_squeeze %22 : memref<1x!tpu.dma_semaphore, #tpu.memory_space<semaphore_mem>> -> memref<!tpu.dma_semaphore, #tpu.memory_space<semaphore_mem>>
    tpu.wait_dma2 semaphore(%23 : memref<!tpu.dma_semaphore, #tpu.memory_space<semaphore_mem>>) src(%19 : memref<10x24x128xbf16, #tpu.memory_space<any>>) dst(%21 : memref<10x24x128xbf16, #tpu.memory_space<vmem>>)
    %24 = arith.index_cast %9 : i32 to index
    %c0 = arith.constant 0 : index
    %c0_13 = arith.constant 0 : index
    %c0_14 = arith.constant 0 : index
    %25 = vector.load %arg10[%24, %c0, %c0_13, %c0_14] : memref<2x10x24x128xbf16, #tpu.memory_space<vmem>>, vector<1x10x24x128xbf16>
    %26 = vector.shape_cast %25 : vector<1x10x24x128xbf16> to vector<10x24x128xbf16>
    %27 = vector.shape_cast %26 : vector<10x24x128xbf16> to vector<240x128xbf16>
    %c0_15 = arith.constant 0 : index
    %c0_16 = arith.constant 0 : index
    %28 = vector.load %arg3[%c0_15, %c0_16] : memref<128x128xbf16, #tpu.memory_space<vmem>>, vector<128x128xbf16>
    %cst = arith.constant dense<0.000000e+00> : vector<240x128xf32>
    %29 = tpu.matmul %27, %28, %cst {dimension_numbers = #tpu.dot_dimension_numbers<[1], [0], [0], [1], [0, 0, 1, 1], [], []>} : vector<240x128xbf16>, vector<128x128xbf16>, vector<240x128xf32> -> vector<240x128xf32>
    %c0_17 = arith.constant 0 : index
    %c0_18 = arith.constant 0 : index
    %30 = vector.load %arg4[%c0_17, %c0_18] : memref<1x128xf32, #tpu.memory_space<vmem>>, vector<1x128xf32>
    %31 = vector.broadcast %30 : vector<1x128xf32> to vector<240x128xf32>
    %32 = arith.addf %29, %31 : vector<240x128xf32>
    %cst_19 = arith.constant 0.000000e+00 : f32
    %33 = vector.broadcast %cst_19 : f32 to vector<240x128xf32>
    %34 = arith.maximumf %32, %33 : vector<240x128xf32>
    %35 = vector.shape_cast %34 : vector<240x128xf32> to vector<10x24x128xf32>
    %36 = tpu.iota {dimensions = array<i32: 0>} : vector<10x24x128xi32>
    %c8_i32_20 = arith.constant 8 : i32
    %37 = arith.muli %arg1, %c8_i32_20 : i32
    %38 = vector.broadcast %37 : i32 to vector<10x24x128xi32>
    %39 = arith.addi %36, %38 : vector<10x24x128xi32>
    %40 = tpu.iota {dimensions = array<i32: 1>} : vector<10x24x128xi32>
    %c1_i32_21 = arith.constant 1 : i32
    %41 = vector.broadcast %c1_i32_21 : i32 to vector<10x24x128xi32>
    %42 = arith.cmpi sge, %39, %41 : vector<10x24x128xi32>
    %c16_i32 = arith.constant 16 : i32
    %43 = vector.broadcast %c16_i32 : i32 to vector<10x24x128xi32>
    %44 = arith.cmpi sle, %39, %43 : vector<10x24x128xi32>
    %45 = arith.andi %42, %44 : vector<10x24x128xi1>
    %c1_i32_22 = arith.constant 1 : i32
    %46 = vector.broadcast %c1_i32_22 : i32 to vector<10x24x128xi32>
    %47 = arith.cmpi sge, %40, %46 : vector<10x24x128xi32>
    %48 = arith.andi %45, %47 : vector<10x24x128xi1>
    %c16_i32_23 = arith.constant 16 : i32
    %49 = vector.broadcast %c16_i32_23 : i32 to vector<10x24x128xi32>
    %50 = arith.cmpi sle, %40, %49 : vector<10x24x128xi32>
    %51 = arith.andi %48, %50 : vector<10x24x128xi1>
    %cst_24 = arith.constant 0.000000e+00 : f32
    %52 = vector.broadcast %cst_24 : f32 to vector<10x24x128xf32>
    %53 = arith.select %51, %35, %52 : vector<10x24x128xi1>, vector<10x24x128xf32>
    %c1_i32_25 = arith.constant 1 : i32
    %54 = tpu.dynamic_rotate %53 by %c1_i32_25 dim 1 : vector<10x24x128xf32>, i32 -> vector<10x24x128xf32>
    %55 = arith.truncf %54 : vector<10x24x128xf32> to vector<10x24x128xbf16>
    %56 = arith.truncf %53 : vector<10x24x128xf32> to vector<10x24x128xbf16>
    %c23_i32 = arith.constant 23 : i32
    %57 = tpu.dynamic_rotate %53 by %c23_i32 dim 1 : vector<10x24x128xf32>, i32 -> vector<10x24x128xf32>
    %58 = arith.truncf %57 : vector<10x24x128xf32> to vector<10x24x128xbf16>
    %59 = tpu.concatenate %55, %56, %58 in 2 : vector<10x24x128xbf16>, vector<10x24x128xbf16>, vector<10x24x128xbf16> -> vector<10x24x384xbf16>
    %cst_26 = arith.constant 0.000000e+00 : f32
    %60 = vector.broadcast %cst_26 : f32 to vector<192x128xf32>
    %61 = vector.extract_strided_slice %59 {offsets = [0, 0, 0], sizes = [8, 24, 384], strides = [1, 1, 1]} : vector<10x24x384xbf16> to vector<8x24x384xbf16>
    %62 = vector.shape_cast %61 : vector<8x24x384xbf16> to vector<192x384xbf16>
    %c0_27 = arith.constant 0 : index
    %c0_28 = arith.constant 0 : index
    %c0_29 = arith.constant 0 : index
    %63 = vector.load %arg5[%c0_27, %c0_28, %c0_29] : memref<3x384x128xbf16, #tpu.memory_space<vmem>>, vector<1x384x128xbf16>
    %64 = vector.shape_cast %63 : vector<1x384x128xbf16> to vector<384x128xbf16>
    %cst_30 = arith.constant dense<0.000000e+00> : vector<192x128xf32>
    %65 = tpu.matmul %62, %64, %cst_30 {dimension_numbers = #tpu.dot_dimension_numbers<[1], [0], [0], [1], [0, 0, 1, 1], [], []>} : vector<192x384xbf16>, vector<384x128xbf16>, vector<192x128xf32> -> vector<192x128xf32>
    %66 = arith.addf %60, %65 : vector<192x128xf32>
    %67 = vector.extract_strided_slice %59 {offsets = [1, 0, 0], sizes = [8, 24, 384], strides = [1, 1, 1]} : vector<10x24x384xbf16> to vector<8x24x384xbf16>
    %68 = vector.shape_cast %67 : vector<8x24x384xbf16> to vector<192x384xbf16>
    %c1 = arith.constant 1 : index
    %c0_31 = arith.constant 0 : index
    %c0_32 = arith.constant 0 : index
    %69 = vector.load %arg5[%c1, %c0_31, %c0_32] : memref<3x384x128xbf16, #tpu.memory_space<vmem>>, vector<1x384x128xbf16>
    %70 = vector.shape_cast %69 : vector<1x384x128xbf16> to vector<384x128xbf16>
    %cst_33 = arith.constant dense<0.000000e+00> : vector<192x128xf32>
    %71 = tpu.matmul %68, %70, %cst_33 {dimension_numbers = #tpu.dot_dimension_numbers<[1], [0], [0], [1], [0, 0, 1, 1], [], []>} : vector<192x384xbf16>, vector<384x128xbf16>, vector<192x128xf32> -> vector<192x128xf32>
    %72 = arith.addf %66, %71 : vector<192x128xf32>
    %73 = vector.extract_strided_slice %59 {offsets = [2, 0, 0], sizes = [8, 24, 384], strides = [1, 1, 1]} : vector<10x24x384xbf16> to vector<8x24x384xbf16>
    %74 = vector.shape_cast %73 : vector<8x24x384xbf16> to vector<192x384xbf16>
    %c2 = arith.constant 2 : index
    %c0_34 = arith.constant 0 : index
    %c0_35 = arith.constant 0 : index
    %75 = vector.load %arg5[%c2, %c0_34, %c0_35] : memref<3x384x128xbf16, #tpu.memory_space<vmem>>, vector<1x384x128xbf16>
    %76 = vector.shape_cast %75 : vector<1x384x128xbf16> to vector<384x128xbf16>
    %cst_36 = arith.constant dense<0.000000e+00> : vector<192x128xf32>
    %77 = tpu.matmul %74, %76, %cst_36 {dimension_numbers = #tpu.dot_dimension_numbers<[1], [0], [0], [1], [0, 0, 1, 1], [], []>} : vector<192x384xbf16>, vector<384x128xbf16>, vector<192x128xf32> -> vector<192x128xf32>
    %78 = arith.addf %72, %77 : vector<192x128xf32>
    %c0_37 = arith.constant 0 : index
    %c0_38 = arith.constant 0 : index
    %79 = vector.load %arg6[%c0_37, %c0_38] : memref<1x128xf32, #tpu.memory_space<vmem>>, vector<1x128xf32>
    %80 = vector.broadcast %79 : vector<1x128xf32> to vector<192x128xf32>
    %81 = arith.addf %78, %80 : vector<192x128xf32>
    %cst_39 = arith.constant 0.000000e+00 : f32
    %82 = vector.broadcast %cst_39 : f32 to vector<192x128xf32>
    %83 = arith.maximumf %81, %82 : vector<192x128xf32>
    %84 = arith.truncf %83 : vector<192x128xf32> to vector<192x128xbf16>
    %c0_40 = arith.constant 0 : index
    %c0_41 = arith.constant 0 : index
    %85 = vector.load %arg7[%c0_40, %c0_41] : memref<128x128xbf16, #tpu.memory_space<vmem>>, vector<128x128xbf16>
    %cst_42 = arith.constant dense<0.000000e+00> : vector<192x128xf32>
    %86 = tpu.matmul %84, %85, %cst_42 {dimension_numbers = #tpu.dot_dimension_numbers<[1], [0], [0], [1], [0, 0, 1, 1], [], []>} : vector<192x128xbf16>, vector<128x128xbf16>, vector<192x128xf32> -> vector<192x128xf32>
    %c0_43 = arith.constant 0 : index
    %c0_44 = arith.constant 0 : index
    %87 = vector.load %arg8[%c0_43, %c0_44] : memref<1x128xf32, #tpu.memory_space<vmem>>, vector<1x128xf32>
    %88 = vector.broadcast %87 : vector<1x128xf32> to vector<192x128xf32>
    %89 = arith.addf %86, %88 : vector<192x128xf32>
    %90 = vector.extract_strided_slice %26 {offsets = [1, 0, 0], sizes = [8, 24, 128], strides = [1, 1, 1]} : vector<10x24x128xbf16> to vector<8x24x128xbf16>
    %91 = vector.shape_cast %90 : vector<8x24x128xbf16> to vector<192x128xbf16>
    %92 = arith.extf %91 : vector<192x128xbf16> to vector<192x128xf32>
    %93 = arith.addf %89, %92 : vector<192x128xf32>
    %cst_45 = arith.constant 0.000000e+00 : f32
    %94 = vector.broadcast %cst_45 : f32 to vector<192x128xf32>
    %95 = arith.maximumf %93, %94 : vector<192x128xf32>
    %96 = vector.shape_cast %95 : vector<192x128xf32> to vector<8x24x128xf32>
    %c0_46 = arith.constant 0 : index
    %c0_47 = arith.constant 0 : index
    %c0_48 = arith.constant 0 : index
    %c0_49 = arith.constant 0 : index
    %97 = vector.load %arg9[%c0_46, %c0_47, %c0_48, %c0_49] : memref<1x8x24x128xf32, #tpu.memory_space<vmem>>, vector<1x8x24x128xf32>
    %98 = vector.shape_cast %97 : vector<1x8x24x128xf32> to vector<8x24x128xf32>
    %99 = vector.shape_cast %96 : vector<8x24x128xf32> to vector<1x8x24x128xf32>
    tpu.vector_store %arg9[%c0_46, %c0_47, %c0_48, %c0_49], %99 {strides = array<i32>} : memref<1x8x24x128xf32, #tpu.memory_space<vmem>>, vector<1x8x24x128xf32>,
    return
  }
  func.func @transform_1(%arg0: i32, %arg1: i32) -> (i32, i32) {
    %c0_i32 = arith.constant 0 : i32
    %c0_i32_0 = arith.constant 0 : i32
    %c0_i32_1 = arith.constant 0 : i32
    return %c0_i32, %c0_i32_0 : i32, i32
  }
  func.func @transform_2(%arg0: i32, %arg1: i32) -> (i32, i32) {
    %c0_i32 = arith.constant 0 : i32
    %c0_i32_0 = arith.constant 0 : i32
    %c0_i32_1 = arith.constant 0 : i32
    return %c0_i32, %c0_i32_0 : i32, i32
  }
  func.func @transform_3(%arg0: i32, %arg1: i32) -> (i32, i32, i32) {
    %c0_i32 = arith.constant 0 : i32
    %c0_i32_0 = arith.constant 0 : i32
    %c0_i32_1 = arith.constant 0 : i32
    %c0_i32_2 = arith.constant 0 : i32
    return %c0_i32, %c0_i32_0, %c0_i32_1 : i32, i32, i32
  }
  func.func @transform_4(%arg0: i32, %arg1: i32) -> (i32, i32) {
    %c0_i32 = arith.constant 0 : i32
    %c0_i32_0 = arith.constant 0 : i32
    %c0_i32_1 = arith.constant 0 : i32
    return %c0_i32, %c0_i32_0 : i32, i32
  }
  func.func @transform_5(%arg0: i32, %arg1: i32) -> (i32, i32) {
    %c0_i32 = arith.constant 0 : i32
    %c0_i32_0 = arith.constant 0 : i32
    %c0_i32_1 = arith.constant 0 : i32
    return %c0_i32, %c0_i32_0 : i32, i32
  }
  func.func @transform_6(%arg0: i32, %arg1: i32) -> (i32, i32) {
    %c0_i32 = arith.constant 0 : i32
    %c0_i32_0 = arith.constant 0 : i32
    %c0_i32_1 = arith.constant 0 : i32
    return %c0_i32, %c0_i32_0 : i32, i32
  }
  func.func @transform_7(%arg0: i32, %arg1: i32) -> (i32, i32, i32, i32) {
    %c0_i32 = arith.constant 0 : i32
    %c0_i32_0 = arith.constant 0 : i32
    %c0_i32_1 = arith.constant 0 : i32
    return %arg0, %arg1, %c0_i32, %c0_i32_0 : i32, i32, i32, i32
  }
}

</mosaic_0001>

<bundles_post_ra>
// kernel: tpu_custom_call.1
= control target key start
LH: loop header
LB: loop body
LE: loop exit
PB: predicated region body
PF: predicated region fallthrough
CT: control target
= control target key end

     0   :  { %s5363_s0 = inlined_call_operand.hbm [shape: bf16[2,18,24,128], index: 0, kind: input, shape index: {}]   ;;  %s5364_s1 = inlined_call_operand.hbm [shape: bf16[128,128], index: 1, kind: input, shape index: {}]   ;;  %s5365_s2 = inlined_call_operand.vmem [shape: f32[1,128], index: 2, kind: input, shape index: {}]   ;;  %s5366_s3 = inlined_call_operand.hbm [shape: bf16[3,384,128], index: 3, kind: input, shape index: {}]   ;;  %s5367_s4 = inlined_call_operand.vmem [shape: f32[1,128], index: 4, kind: input, shape index: {}]   ;;  %s5368_s5 = inlined_call_operand.hbm [shape: bf16[128,128], index: 5, kind: input, shape index: {}]   ;;  %s5369_s6 = inlined_call_operand.vmem [shape: f32[1,128], index: 6, kind: input, shape index: {}]   ;;  %s5370_s7 = inlined_call_operand.hbm [shape: f32[2,16,24,128], index: 7, kind: output, shape index: {}]  }
   0x1   :  { %5401 = sst [smem:[#allocation46_spill]] %s5366_s3 }
   0x2   :  { %12 = vsyncpa [#allocation5], 0 }
   0x3   :  { %13 = vsyncpa [#allocation8], 0 }
   0x4   :  { %14 = vsyncpa [#allocation6], 0 }
   0x5   :  { %16 = vsyncpa [#allocation6 + $0x1], 0  ;;  %s4013_s24 = smov 0   ;;  %s4015_s25 = smov 0  }
   0x6   :  { %s4017_s26 = smov 0   ;;  %s4019_s27 = smov 0  }
   0x7   :  { %s4021_s28 = smov 0   ;;  %s4023_s29 = smov 0  }
   0x8   :  { %s4025_s30 = smov 0   ;;  %s4027_s8 = smov 0  }
   0x9 LB: > { %5402 = sst [smem:[#allocation21_spill]] %s3943_s26  ;;  %s3024_s9 = sadd.s32 4294967295, %s3963_s8   ;;  %s3963_s8 = sphi %s4027_s8, %s22_s8   ;;  %s3959_s30 = sphi %s4025_s30, %s5506_s30   ;;  %s3955_s29 = sphi %s4023_s29, %s5505_s29   ;;  %s3951_s28 = sphi %s4021_s28, %s5504_s28   ;;  %s3947_s27 = sphi %s4019_s27, %s5503_s27   ;;  %s3943_s26 = sphi %s4017_s26, %s5502_s26   ;;  %s3939_s25 = sphi %s4015_s25, %s5508_s25   ;;  %s3935_s24 = sphi %s4013_s24, %s5507_s24  }
   0xa   : > { %5403 = sst [smem:[#allocation22_spill]] %s3955_s29  ;;  %s3025_s10 = sadd.s32 4294967294, %s3963_s8  }
   0xb   : > { %5404 = sst [smem:[#allocation23_spill]] %s3959_s30  ;;  %s31_s11 = sadd.s32 1, %s3955_s29 }
   0xc   : > { %s34_s12 = sadd.s32 1, %s3959_s30  ;;  %p32_p0 = scmp.ge.s32.totalorder %s31_s11, 2 }
   0xd   : > { %s169_s13 = sadd.s32 1, %s3943_s26  ;;  %p179_p1 = scmp.ne.s32.totalorder %s3943_s26, %s3939_s25 }
   0xe   : > { %p180_p2 = scmp.eq.s32.totalorder %s3024_s9, 3  ;;  %s5510_s11 = smov (%p32_p0, %s31_s11), 0 }
   0xf   : > { %5405 = sst [smem:[#allocation24_spill]] %s5510_s11  ;;  %s5512_s12 = smov (!%p32_p0, %s34_s12), %s3959_s30 }
  0x10   : > { %s165_s14 = ssub.s32 %s3955_s29, %s5510_s11  ;;  %p4065_p3 = por %p180_p2, %p179_p1 }
  0x11   : > { %p36_p4 = scmp.ge.s32.totalorder %s5512_s12, 2  ;;  %p185_p5 = scmp.ne.s32.totalorder %s3939_s25, %s3935_s24 }
  0x12   : > { %p186_p6 = scmp.eq.s32.totalorder %s3025_s10, 3  ;;  %p3026_p7 = scmp.ge.s32.totalorder %s3963_s8, 1 }
  0x13   : > { %s5514_s12 = smov (%p36_p4, %s5512_s12), 0  ;;  %p193_p9 = scmp.lt.s32.totalorder %s3963_s8, 5 }
  0x14   : > { %5407 = sst [smem:[#allocation25_spill]] %s5514_s12  ;;  %p4074_p8 = por %p186_p6, %p185_p5 }
  0x15   : > { %s164_s17 = ssub.s32 %s3959_s30, %s5514_s12  ;;  %p4081_p10 = pnand %p3026_p7, %p193_p9 }
  0x16   : > { %s5408_s16 = scalar_select %p4074_p8, 1, 0 }
  0x17   : > { %s166_s18 = sor.u32 %s165_s14, %s164_s17  ;;  %p4085_p12 = scmp.eq.s32.totalorder %s3024_s9, 0 }
  0x18   : > { %p167_p11 = scmp.eq.s32.totalorder %s166_s18, 0  ;;  %p3614_p13 = pneg %p4081_p10 }
  0x19   : > { %s5413_s3 = sld [smem:[#allocation46_spill]]  ;;  %s3965_s9 = smov [#allocation7]  }
  0x1a   : > { %s4092_s21 = scalar_select %p167_p11, %s3943_s26, %s169_s13  }
  0x1b   : > { %p4096_p0 = pnand %p4085_p12, %p3614_p13  ;;  %s223_s17 = sshll.u32 %s3965_s9, 4  ;;  %s224_s17 = int_to_ptr.vmem [resolvable:$true] %s223_s17 }
  0x1c   : > { %5411 = sst [smem:[#allocation26_spill]] %s4092_s21  ;;  %s3966_s18 = smov 64  }
  0x1d   : > { %s3967_s12 = smov 4   ;;  %s204_s30 = sshll.u32 %s5364_s1, 4  ;;  %s205_s30 = int_to_ptr.hbm [resolvable:$true] %s204_s30 }
  0x1e   : > { %s3968_s29 = smov [#allocation4]   ;;  %s3969_s9 = smov [#allocation9]  }
  0x1f   : > { %s221_s14 = sshll.u32 %s5413_s3, 4  ;;  %s206_s21 = sshll.u32 %s3968_s29, 4  ;;  %s222_s14 = int_to_ptr.hbm [resolvable:$true] %s221_s14  ;;  %s207_s21 = int_to_ptr.vmem [resolvable:$true] %s206_s21 }
  0x20   : > { %3620 = dma.hbm_to_vmem [thread:$0]  (!%p4096_p0), %s222_s14, 9216, %s224_s17, [#allocation8], %s3966_s18, %s3966_s18, %s3967_s12  }
  0x21   : > { %s238_s3 = sshll.u32 %s5368_s5, 4  ;;  %s240_s26 = sshll.u32 %s3969_s9, 4  ;;  %s239_s3 = int_to_ptr.hbm [resolvable:$true] %s238_s3  ;;  %s241_s26 = int_to_ptr.vmem [resolvable:$true] %s240_s26 }
  0x22   : > { %3617 = dma.hbm_to_vmem [thread:$0]  (!%p4096_p0), %s205_s30, 1024, %s207_s21, [#allocation5], %s3966_s18, %s3966_s18, %s3967_s12  }
  0x23   : > { %3623 = dma.hbm_to_vmem [thread:$0]  (!%p4096_p0), %s239_s3, 1024, %s241_s26, [#allocation8], %s3966_s18, %s3966_s18, %s3967_s12  }
  0x24   : > { %259 = sbr.rel (%p4081_p10) target bundleno = 1181 (0x49d), region = 44 }
  0x29   : > { %3920 = dma.done.wait (%p4085_p12), [#allocation5], 1024  }
  0x2a   : > { %3922 = vsyncadd (%p4085_p12), [#allocation5], 4294966272 }
  0x2b   : > { %3924 = dma.done.wait (%p4085_p12), [#allocation8], 10240  }
  0x2c   : > { %3926 = vsyncadd (%p4085_p12), [#allocation8], 4294957056  ;;  %s5376_s3 = sand.u32 1, %s3939_s25   ;;  %p3634_p1 = scmp.eq.s32.totalorder %s3947_s27, 0 }
  0x2d   : > { %s4128_s26 = smul.u32 192, %s5376_s3  ;;  %s5377_s30 = smov [#allocation2]  }
  0x2e   : > { %s3463_s29 = smul.u32 216, %s3951_s28  ;;  %s324_s11 = sshll.u32 %s5377_s30, 4  ;;  %s325_s11 = int_to_ptr.vmem [resolvable:$true] %s324_s11 }
  0x2f   : > { %p296_p2 = scmp.lt.s32.totalorder %s3947_s27, 0  ;;  %s297_s22 = ssub.s32 0, %s3947_s27 }
  0x30   : > { %s314_s20 = scalar_lea.hbm %s5363_s0, %s3463_s29  ;;  %s5379_s23 = scalar_lea.hbm %s5363_s0, 432 }
  0x31   : > { %s322_s21 = sshll.u32 %s314_s20, 4  ;;  %s323_s21 = int_to_ptr.hbm [resolvable:$true] %s322_s21 }
  0x32   : > { %s3803_s14 = sshra.s32 %s323_s21, 4  ;;  %s3804_s14 = int_to_ptr.hbm [resolvable:$true] %s3803_s14 }
  0x33   : > { %s3805_s17 = scalar_lea.hbm %s3804_s14, 120  ;;  %p3810_p7 = scmp.lt.s32.totalorder %s3804_s14, %s5363_s0 }
  0x34   : > { %p3806_p4 = scmp.ne.s32.totalorder %s3804_s14, %s3805_s17  ;;  %p3811_p9 = scmp.lt.s32.totalorder %s5379_s23, %s3805_s17 }
  0x36   : > { %p3807_p5 = pnand %p3806_p4, %p3634_p1  ;;  %p3812_p10 = por %p3811_p9, %p3810_p7 }
  0x38   : > { %p3808_p6 = pneg %p3807_p5 }
  0x3a   : > { %p3813_p11 = pnand %p3812_p10, %p3808_p6 }
  0x3c   : > { %3816 = shalt.err (!%p3813_p11)  }
  0x3d   : > { %3609 = dma.hbm_to_vmem [thread:$0]  (%p3634_p1), %s323_s21, 1920, %s325_s11, [#allocation3] }
  0x3e   : > { %s3034_s19 = smin.u32 %s3947_s27, %s297_s22  ;;  %s328_s20 = sadd.s32 1, %s3947_s27 }
  0x3f   : > { %s299_s14 = sand.u32 1, %s3034_s19   ;;  %s5378_s17 = smul.u32 24, %s3947_s27 }
  0x40   : > { %s300_s18 = ssub.s32 0, %s299_s14  ;;  %s2949_s9 = smul.u32 54, %s3951_s28 }
  0x41   : > { %s5516_s18 = smov (!%p296_p2, %s300_s18), %s299_s14  ;;  %p4161_p13 = scmp.lt.s32.totalorder %s328_s20, 2 }
  0x42   : > { %p3036_p12 = scmp.lt.s32.totalorder %s5516_s18, 0  ;;  %s306_s10 = sadd.s32 2, %s5516_s18 }
  0x43   : > { %s2950_s11 = sadd.s32 %s2949_s9, %s5378_s17  ;;  %s5416_s19 = scalar_lea.hbm %s5363_s0, 432 }
  0x44   : > { %s5518_s10 = smov (!%p3036_p12, %s306_s10), %s5516_s18  ;;  %s3040_s22 = sshll.u32 %s2950_s11, 2 }
  0x45   : > { %s333_s21 = ssub.s32 1, %s5518_s10  ;;  %s2952_s14 = scalar_lea.hbm %s5363_s0, %s3040_s22 }
  0x46   : > { %s3464_s3 = smul.u32 120, %s333_s21  ;;  %s2953_s13 = scalar_lea.hbm %s2952_s14, 96 }
  0x47   : > { %s4171_s30 = sshll.u32 %s2953_s13, 4  ;;  %s3465_s9 = smul.u32 120, %s5518_s10  ;;  %s5381_s30 = int_to_ptr.hbm [resolvable:$true] %s4171_s30 }
  0x48   : > { %5415 = sst [smem:[#allocation27_spill]] %s4171_s30  ;;  %s342_s20 = scalar_lea.vmem [#allocation2], %s3464_s3 }
  0x49   : > { %s4174_s18 = sshll.u32 %s342_s20, 4  ;;  %s343_s17 = scalar_lea.sflag [#allocation3], %s333_s21  ;;  %s354_s18 = int_to_ptr.vmem [resolvable:$true] %s4174_s18 }
  0x4a   : > { %s3831_s11 = sshra.s32 %s5381_s30, 4  ;;  %s3832_s11 = int_to_ptr.hbm [resolvable:$true] %s3831_s11 }
  0x4b   : > { %s3833_s23 = scalar_lea.hbm %s3832_s11, 120  ;;  %p3838_p4 = scmp.lt.s32.totalorder %s3832_s11, %s5363_s0 }
  0x4c   : > { %p3834_p0 = scmp.ne.s32.totalorder %s3832_s11, %s3833_s23  ;;  %p3839_p5 = scmp.lt.s32.totalorder %s5416_s19, %s3833_s23 }
  0x4e   : > { %p3835_p1 = pnand %p3834_p0, %p4161_p13  ;;  %p3840_p6 = por %p3839_p5, %p3838_p4 }
  0x50   : > { %p3836_p2 = pneg %p3835_p1 }
  0x52   : > { %p3841_p7 = pnand %p3840_p6, %p3836_p2 }
  0x54   : > { %3844 = shalt.err (!%p3841_p7)  }
  0x55   : > { %s3845_s21 = sshra.s32 %s354_s18, 4  ;;  %s5417_s20 = smov [#allocation2]   ;;  %s3846_s21 = int_to_ptr.vmem [resolvable:$true] %s3845_s21 }
  0x56   : > { %s3847_s14 = scalar_lea.vmem %s3846_s21, 120  ;;  %s3851_s30 = scalar_lea.vmem %s5417_s20, 240 }
  0x57   : > { %p3848_p9 = scmp.ne.s32.totalorder %s3846_s21, %s3847_s14  ;;  %p3852_p12 = scmp.lt.s32.totalorder %s3846_s21, [#allocation2] }
  0x58   : > { %p3853_p0 = scmp.lt.s32.totalorder %s3851_s30, %s3847_s14 }
  0x59   : > { %p3849_p10 = pnand %p3848_p9, %p4161_p13 }
  0x5a   : > { %p3854_p1 = por %p3853_p0, %p3852_p12 }
  0x5b   : > { %p3850_p11 = pneg %p3849_p10 }
  0x5d   : > { %p3855_p8 = pnand %p3854_p1, %p3850_p11 }
  0x5f   : > { %3858 = shalt.err (!%p3855_p8)  }
  0x60   : > { %s5418_s23 = sld [smem:[#allocation27_spill]]  ;;  %s4197_s13 = scalar_lea.vmem [#allocation10], %s4128_s26 }
  0x61   : > { %s4199_s22 = scalar_lea.vmem [#allocation2], %s3465_s9  ;;  %s361_s12 = scalar_lea.sflag [#allocation3], %s5518_s10 }
  0x66   : > { %s5419_s11 = int_to_ptr.hbm [resolvable:$true] %s5418_s23 }
  0x67   : > { %3611 = dma.hbm_to_vmem [thread:$0]  (%p4161_p13), %s5419_s11, 1920, %s354_s18, %s343_s17 }
  0x68   : > { %3927 = dma.done.wait %s361_s12, 1920 }
  0x69   : > { %3928 = vsyncadd %s361_s12, 4294965376  ;;  %v3488_v0 = vld [vmem:[#allocation4 + $0x38] sm:$0xff]  ;;  %v3487_v1 = vld [vmem:[#allocation4 + $0x30] sm:$0xff]  ;;  %v679_v16 = vlaneseq  ;;  %s5420_s17 = sshll.u32 %s3947_s27, 3  ;;  %s3595_s21 = smul.u32 48, %s3951_s28 }
  0x6a   : > { %555 = vmatpush.bf16.msra.mxu0 %v3488_v0  ;;  %v3486_v2 = vld [vmem:[#allocation4 + $0x28] sm:$0xff]  ;;  %v3485_v3 = vld [vmem:[#allocation4 + $0x20] sm:$0xff]  ;;  %v3484_v4 = vld [vmem:[#allocation4 + $0x18] sm:$0xff]  ;;  %v4217_v18 = vstv %s5420_s17  ;;  %s5498_s14 = smul.u32 24, %s3947_s27  ;;  %s2899_s28 = sshll.u32 %s4197_s13, 4  ;;  %s2900_s28 = int_to_ptr.vmem [resolvable:$true] %s2899_s28 }
  0x6b   : > { %v3483_v5 = vld [vmem:[#allocation4 + $0x10] sm:$0xff]  ;;  %v3482_v6 = vld [vmem:[#allocation4 + $0x8] sm:$0xff]  ;;  %v3481_v7 = vld [vmem:[#allocation4] sm:$0xff]  ;;  %v4219_v19 = vshrl.u32 %v679_v16, 7  ;;  %vm683_vm0 = vcmp.ge.s32.totalorder %v4217_v18, 1  ;;  %vm693_vm1 = vcmp.le.s32.totalorder %v4217_v18, 16 }
  0x6c   : > { %v3466_v8 = vld [vmem:[%s4199_s22] sm:$0xff]  ;;  %v3467_v9 = vld [vmem:[%s4199_s22 + $0x8] sm:$0xff]  ;;  %v3468_v10 = vld [vmem:[%s4199_s22 + $0x10] sm:$0xff]  ;;  %v670_v41 = vadd.s32 1, %v4217_v18  ;;  %s2896_s20 = sadd.s32 %s3595_s21, %s5498_s14  ;;  %s3879_s9 = scalar_lea.hbm %s5370_s7, 768 }
  0x6d   : > { %v3469_v11 = vld [vmem:[%s4199_s22 + $0x18] sm:$0xff]  ;;  %v3470_v12 = vld [vmem:[%s4199_s22 + $0x20] sm:$0xff]  ;;  %v3471_v13 = vld [vmem:[%s4199_s22 + $0x28] sm:$0xff]  ;;  %vm713_vm3 = vcmp.ge.s32.totalorder %v4219_v19, 1  ;;  %v4236_v29 = vadd.s32 16, %v4219_v19  ;;  %vm839_vm5 = vcmp.lt.s32.totalorder %v4219_v19, 1 }
  0x6e   : > { %556 = vmatpush.bf16.msra.mxu0 %v3487_v1  ;;  %v3472_v14 = vld [vmem:[%s4199_s22 + $0x30] sm:$0xff]  ;;  %v3473_v15 = vld [vmem:[%s4199_s22 + $0x38] sm:$0xff]  ;;  %v4213_v17 = vld [vmem:[%s5365_s2] ss:$0 sm:$0xff]  ;;  %vm960_vm6 = vcmp.lt.s32.totalorder %v4219_v19, 7  ;;  %vm684_vm9 = vcmp.ge.s32.totalorder %v670_v41, 1 }
  0x6f   : > { %v3474_v20 = vld [vmem:[%s4199_s22 + $0x40] sm:$0xff]  ;;  %vm4225_vm2 = vmand %vm683_vm0, %vm693_vm1  ;;  %v4238_v30 = vld [vmem:[#allocation7 + $0x138] sm:$0xff]  ;;  %vm748_vm7 = vcmp.le.s32.totalorder %v4236_v29, 16  ;;  %vm694_vm10 = vcmp.le.s32.totalorder %v670_v41, 16  ;;  %s3458_s23 = sshll.u32 %s2896_s20, 3 }
  0x70   : > { %vm716_vm4 = vmand %vm4225_vm2, %vm713_vm3  ;;  %3577 = vmatpush.bf16.msra.mxu2 %v4238_v30  ;;  %v3520_v37 = vld [vmem:[#allocation7 + $0xf8] sm:$0xff]  ;;  %v4250_v42 = vld [vmem:[#allocation7 + $0x130] sm:$0xff]  ;;  %s2898_s26 = scalar_lea.hbm %s5370_s7, %s3458_s23 }
  0x71   : > { %v4245_v38 = vld [vmem:[#allocation7 + $0x178] sm:$0xff]  ;;  %3569 = vmatpush.bf16.msra.mxu1 %v3520_v37  ;;  %vm751_vm8 = vmand %vm4225_vm2, %vm748_vm7  ;;  %v3519_v49 = vld [vmem:[#allocation7 + $0xf0] sm:$0xff]  ;;  %s2901_s27 = sshll.u32 %s2898_s26, 4  ;;  %s2902_s27 = int_to_ptr.hbm [resolvable:$true] %s2901_s27 }
  0x72   : > { %557 = vmatpush.bf16.msra.mxu0 %v3486_v2  ;;  %v3475_v40 = vld [vmem:[%s4199_s22 + $0x48] sm:$0xff]  ;;  %3585 = vmatpush.bf16.msra.mxu3 %v4245_v38  ;;  %v4271_v53 = vld [vmem:[#allocation7 + $0x128] sm:$0xff]  ;;  %vm4277_vm11 = vmand %vm684_vm9, %vm694_vm10  ;;  %s3873_s17 = sshra.s32 %s2902_s27, 4  ;;  %s3874_s17 = int_to_ptr.hbm [resolvable:$true] %s3873_s17 }
  0x73   : > { %v4267_v50 = vld [vmem:[#allocation7 + $0x170] sm:$0xff]  ;;  %v3518_v57 = vld [vmem:[#allocation7 + $0xe8] sm:$0xff]  ;;  %v4281_v61 = vld [vmem:[#allocation7 + $0x120] sm:$0xff]  ;;  %s3875_s10 = scalar_lea.hbm %s3874_s17, 192  ;;  %p3880_p4 = scmp.lt.s32.totalorder %s3874_s17, %s5370_s7 }
  0x74   : > { %3578 = vmatpush.bf16.msra.mxu2 %v4250_v42  ;;  %v4275_v58 = vld [vmem:[#allocation7 + $0x168] sm:$0xff]  ;;  %vm719_vm12 = vmand %vm4277_vm11, %vm713_vm3  ;;  %v3516_v23 = vld [vmem:[#allocation7 + $0xd8] sm:$0xff]  ;;  %p3876_p8 = scmp.ne.s32.totalorder %s3874_s17, %s3875_s10  ;;  %p3881_p5 = scmp.lt.s32.totalorder %s3879_s9, %s3875_s10 }
  0x75   : > { %3570 = vmatpush.bf16.msra.mxu1 %v3519_v49  ;;  %vm754_vm13 = vmand %vm4277_vm11, %vm748_vm7  ;;  %v3495_v60 = vld [vmem:[#allocation7 + $0x30] sm:$0xff] }
  0x76   : > { %558 = vmatpush.bf16.msra.mxu0 %v3485_v3  ;;  %3586 = vmatpush.bf16.msra.mxu3 %v4267_v50  ;;  %p3877_p13 = pnand %p3876_p8, %p4065_p3  ;;  %p3882_p6 = por %p3881_p5, %p3880_p4 }
  0x78   : > { %3579 = vmatpush.bf16.msra.mxu2 %v4271_v53  ;;  %p3878_p2 = pneg %p3877_p13 }
  0x79   : > { %3571 = vmatpush.bf16.msra.mxu1 %v3518_v57 }
  0x7a   : > { %559 = vmatpush.bf16.msra.mxu0 %v3484_v4  ;;  %3587 = vmatpush.bf16.msra.mxu3 %v4275_v58  ;;  %p3883_p7 = pnand %p3882_p6, %p3878_p2 }
  0x7c   : > { %3580 = vmatpush.bf16.msra.mxu2 %v4281_v61 }
  0x7e   : > { %560 = vmatpush.bf16.msra.mxu0 %v3483_v5 }
  0x82   : > { %561 = vmatpush.bf16.msra.mxu0 %v3482_v6  ;;  %v3517_v6 = vld [vmem:[#allocation7 + $0xe0] sm:$0xff] }
  0x83   : > { %3572 = vmatpush.bf16.msra.mxu1 %v3517_v6 }
  0x86   : > { %562 = vmatpush.bf16.msra.mxu0 %v3481_v7  ;;  %v4298_v7 = vld [vmem:[#allocation7 + $0x160] sm:$0xff] }
  0x87   : > { %3588 = vmatpush.bf16.msra.mxu3 %v4298_v7  ;;  %3573 = vmatpush.bf16.msra.mxu1 %v3516_v23 }
  0x89   : > { %563 = vmatmul.bf16.vlgmr.msra.gmra.mxu0 %v3466_v8 }
  0x8a   : > { %1514 = vmatpush.bf16.msrb.mxu0 %v3520_v37  ;;  %v4340_v37 = vld [vmem:[#allocation7 + $0x108] sm:$0xff] }
  0x8e   : > { %1515 = vmatpush.bf16.msrb.mxu0 %v3519_v49  ;;  %v4348_v49 = vld [vmem:[#allocation7 + $0x148] sm:$0xff] }
  0x92   : > { %1516 = vmatpush.bf16.msrb.mxu0 %v3518_v57 }
  0x96   : > { %1517 = vmatpush.bf16.msrb.mxu0 %v3517_v6 }
  0x99   : > { %568 = vmatmul.bf16.gmra.mxu0 %v3467_v9 }
  0x9a   : > { %1518 = vmatpush.bf16.msrb.mxu0 %v3516_v23 }
  0xa9   : > { %573 = vmatmul.bf16.gmra.mxu0 %v3468_v10 }
  0xb9   : > { %578 = vmatmul.bf16.gmra.mxu0 %v3469_v11  ;;  %v4306_v11 = vld [vmem:[#allocation7 + $0x118] sm:$0xff] }
  0xba   : > { %3581 = vmatpush.bf16.msra.mxu2 %v4306_v11 }
  0xc9   : > { %583 = vmatmul.bf16.gmra.mxu0 %v3470_v12 }
  0xd9   : > { %588 = vmatmul.bf16.gmra.mxu0 %v3471_v13 }
  0xe9   : > { %593 = vmatmul.bf16.gmra.mxu0 %v3472_v14 }
  0xf9   : > { %598 = vmatmul.bf16.gmra.mxu0 %v3473_v15 }
 0x106   : > { %v564_v21 = vpop.f32.mrf.mxu0 }
 0x107   : > { %v565_v22 = vadd.f32 %v4213_v17, %v564_v21 }
 0x109   : > { %603 = vmatmul.bf16.gmra.mxu0 %v3474_v20  ;;  %v639_v24 = vmax.f32 %v565_v22, 0.0 }
 0x10b   : > { %v779_v26 = vsel %vm716_vm4, %v639_v24, 0.0  ;;  %v4324_v24 = vld [vmem:[#allocation7 + $0x158] sm:$0xff] }
 0x10c   : > { %v900_v31 = vpack.c.bf16 %v779_v26, %v779_v26  ;;  %v809_v32 = vrot.slane %v779_v26, 7  ;;  %v930_v34 = vrot.slane %v779_v26, 1  ;;  %v4327_v26 = vld [vmem:[#allocation7 + $0x110] sm:$0xff]  ;;  %3589 = vmatpush.bf16.msra.mxu3 %v4324_v24 }
 0x10d   : > { %3582 = vmatpush.bf16.msra.mxu2 %v4327_v26 }
 0x10e   : > { %v566_v25 = vpop.f32.mrf.mxu0  ;;  %v4252_v43 = vunpack.c.l.b16 %v900_v31 }
 0x10f   : > { %v567_v27 = vadd.f32 %v4213_v17, %v566_v25  ;;  %v3476_v25 = vld [vmem:[%s4199_s22 + $0x50] sm:$0xff] }
 0x111   : > { %v640_v28 = vmax.f32 %v567_v27, 0.0  ;;  %3583 = vmatpush.bf16.msra.mxu2 %v4340_v37 }
 0x113   : > { %v780_v33 = vsel %vm4225_vm2, %v640_v28, 0.0 }
 0x114   : > { %v819_v35 = vrot.slane %v780_v33, 7  ;;  %v940_v36 = vrot.slane %v780_v33, 1  ;;  %v901_v39 = vpack.c.bf16 %v780_v33, %v780_v33  ;;  %v3515_v33 = vld [vmem:[#allocation7 + $0xd0] sm:$0xff] }
 0x115   : > { %3574 = vmatpush.bf16.msra.mxu1 %v3515_v33  ;;  %1519 = vmatpush.bf16.msrb.mxu0 %v3515_v33 }
 0x116   : > { %v569_v44 = vpop.f32.mrf.mxu0  ;;  %v4255_v45 = vunpack.c.l.b16 %v901_v39  ;;  %v971_v46 = vsel %vm960_vm6, %v930_v34, %v940_v36  ;;  %v850_v47 = vsel %vm839_vm5, %v809_v32, %v819_v35 }
 0x117   : > { %v570_v48 = vadd.f32 %v4213_v17, %v569_v44  ;;  %v991_v59 = vpack.c.bf16 %v971_v46, %v971_v46  ;;  %v871_v62 = vpack.c.bf16 %v850_v47, %v850_v47 }
 0x119   : > { %v641_v52 = vmax.f32 %v570_v48, 0.0  ;;  %608 = vmatmul.bf16.gmra.mxu0 %v3475_v40  ;;  %v4300_v8 = vunpack.c.l.b16 %v991_v59  ;;  %v4312_v14 = vunpack.c.l.b16 %v871_v62  ;;  %v3514_v48 = vld [vmem:[#allocation7 + $0xc8] sm:$0xff] }
 0x11a   : > { %3575 = vmatpush.bf16.msra.mxu1 %v3514_v48  ;;  %1520 = vmatpush.bf16.msrb.mxu0 %v3514_v48 }
 0x11b   : > { %v781_v54 = vsel %vm751_vm8, %v641_v52, 0.0  ;;  %v4350_v52 = vld [vmem:[#allocation7 + $0x100] sm:$0xff] }
 0x11c   : > { %v829_v55 = vrot.slane %v781_v54, 7  ;;  %v950_v56 = vrot.slane %v781_v54, 1  ;;  %v902_v15 = vpack.c.bf16 %v781_v54, %v781_v54  ;;  %3584 = vmatpush.bf16.msra.mxu2 %v4350_v52 }
 0x11e   : > { %v571_v63 = vpop.f32.mrf.mxu0  ;;  %v961_v0 = vsel %vm960_vm6, %v940_v36, %v950_v56  ;;  %v860_v1 = vsel %vm839_vm5, %v829_v55, %v809_v32  ;;  %v4290_v2 = vsel %vm960_vm6, %v950_v56, %v930_v34  ;;  %v4304_v9 = vsel %vm839_vm5, %v819_v35, %v829_v55  ;;  %v4336_v34 = vld [vmem:[#allocation7 + $0x150] sm:$0xff] }
 0x11f   : > { %v572_v3 = vadd.f32 %v4213_v17, %v571_v63  ;;  %v992_v4 = vpack.c.bf16 %v961_v0, %v961_v0  ;;  %v870_v5 = vpack.c.bf16 %v860_v1, %v860_v1  ;;  %v4332_v31 = vunpack.c.l.b16 %v902_v15  ;;  %3590 = vmatpush.bf16.msra.mxu3 %v4336_v34  ;;  %v3513_v1 = vld [vmem:[#allocation7 + $0xc0] sm:$0xff] }
 0x120   : > { %v993_v54 = vpack.c.bf16 %v4290_v2, %v4290_v2  ;;  %v4369_v2 = vld [vmem:[#allocation7 + $0x140] sm:$0xff]  ;;  %3576 = vmatpush.bf16.msra.mxu1 %v3513_v1  ;;  %1521 = vmatpush.bf16.msrb.mxu0 %v3513_v1  ;;  %v872_v23 = vpack.c.bf16 %v4304_v9, %v4304_v9 }
 0x121   : > { %v642_v10 = vmax.f32 %v572_v3, 0.0  ;;  %v4308_v12 = vunpack.c.l.b16 %v992_v4  ;;  %v4310_v13 = vunpack.c.l.b16 %v870_v5  ;;  %v671_v5 = vadd.s32 2, %v4217_v18 }
 0x122   : > { %v4374_v6 = vunpack.c.l.b16 %v993_v54 }
 0x123   : > { %v4315_v16 = vsel %vm719_vm12, %v642_v10, 0.0  ;;  %3591 = vmatpush.bf16.msra.mxu3 %v4348_v49  ;;  %vm685_vm14 = vcmp.ge.s32.totalorder %v671_v5, 1  ;;  %vm695_vm15 = vcmp.le.s32.totalorder %v671_v5, 16 }
 0x124   : > { %v903_v22 = vpack.c.bf16 %v4315_v16, %v4315_v16  ;;  %v810_v39 = vrot.slane %v4315_v16, 7  ;;  %v931_v41 = vrot.slane %v4315_v16, 1  ;;  %1583 = vmatpush.bf16.msra.mxu0 %v4238_v30  ;;  %vm4403_vm0 = vmand %vm685_vm14, %vm695_vm15 }
 0x125   : > { %vm722_vm1 = vmand %vm4403_vm0, %vm713_vm3 }
 0x126   : > { %v4329_v27 = vunpack.c.l.b16 %v903_v22  ;;  %v574_v28 = vpop.f32.mrf.mxu0  ;;  %vm757_vm2 = vmand %vm4403_vm0, %vm748_vm7 }
 0x127   : > { %v575_v32 = vadd.f32 %v4213_v17, %v574_v28  ;;  %3592 = vmatpush.bf16.msra.mxu3 %v4369_v2 }
 0x128   : > { %1584 = vmatpush.bf16.msra.mxu0 %v4250_v42 }
 0x129   : > { %v643_v36 = vmax.f32 %v575_v32, 0.0  ;;  %613 = vmatmul.bf16.gmra.mxu0 %v3476_v25  ;;  %v3477_v25 = vld [vmem:[%s4199_s22 + $0x58] sm:$0xff] }
 0x12b   : > { %v783_v40 = vsel %vm4277_vm11, %v643_v36, 0.0 }
 0x12c   : > { %v820_v44 = vrot.slane %v783_v40, 7  ;;  %v904_v46 = vpack.c.bf16 %v783_v40, %v783_v40  ;;  %v941_v47 = vrot.slane %v783_v40, 1  ;;  %1585 = vmatpush.bf16.msra.mxu0 %v4271_v53 }
 0x12e   : > { %v851_v55 = vsel %vm839_vm5, %v810_v39, %v820_v44  ;;  %v972_v56 = vsel %vm960_vm6, %v931_v41, %v941_v47  ;;  %v4358_v57 = vunpack.c.l.b16 %v904_v46  ;;  %v576_v59 = vpop.f32.mrf.mxu0 }
 0x12f   : > { %v994_v62 = vpack.c.bf16 %v972_v56, %v972_v56  ;;  %v577_v63 = vadd.f32 %v4213_v17, %v576_v59  ;;  %v874_v28 = vpack.c.bf16 %v851_v55, %v851_v55  ;;  %v4397_v56 = vunpack.c.l.b16 %v872_v23 }
 0x130   : > { %1586 = vmatpush.bf16.msra.mxu0 %v4281_v61 }
 0x131   : > { %v4371_v3 = vunpack.c.l.b16 %v994_v62  ;;  %v644_v4 = vmax.f32 %v577_v63, 0.0  ;;  %v4409_v42 = vunpack.c.l.b16 %v874_v28 }
 0x133   : > { %v784_v10 = vsel %vm754_vm13, %v644_v4, 0.0 }
 0x134   : > { %v830_v15 = vrot.slane %v784_v10, 7  ;;  %v951_v16 = vrot.slane %v784_v10, 1  ;;  %v905_v22 = vpack.c.bf16 %v784_v10, %v784_v10  ;;  %1587 = vmatpush.bf16.msra.mxu0 %v4306_v11 }
 0x136   : > { %v962_v32 = vsel %vm960_vm6, %v941_v47, %v951_v16  ;;  %v579_v33 = vpop.f32.mrf.mxu0  ;;  %v861_v36 = vsel %vm839_vm5, %v830_v15, %v810_v39  ;;  %v841_v40 = vsel %vm839_vm5, %v820_v44, %v830_v15  ;;  %v4389_v46 = vunpack.c.l.b16 %v905_v22 }
 0x137   : > { %v995_v30 = vpack.c.bf16 %v962_v32, %v962_v32  ;;  %v580_v48 = vadd.f32 %v4213_v17, %v579_v33  ;;  %v873_v9 = vpack.c.bf16 %v861_v36, %v861_v36  ;;  %v875_v54 = vpack.c.bf16 %v841_v40, %v841_v40 }
 0x138   : > { %v982_v55 = vsel %vm960_vm6, %v951_v16, %v931_v41  ;;  %1588 = vmatpush.bf16.msra.mxu0 %v4327_v26 }
 0x139   : > { %v4399_v39 = vunpack.c.l.b16 %v995_v30  ;;  %618 = vmatmul.bf16.gmra.mxu0 %v3477_v25  ;;  %v4407_v59 = vunpack.c.l.b16 %v873_v9  ;;  %v4411_v62 = vunpack.c.l.b16 %v875_v54  ;;  %v996_v41 = vpack.c.bf16 %v982_v55, %v982_v55  ;;  %v3504_v30 = vld [vmem:[#allocation7 + $0x78] sm:$0xff]  ;;  %v3478_v9 = vld [vmem:[%s4199_s22 + $0x60] sm:$0xff] }
 0x13a   : > { %v645_v63 = vmax.f32 %v580_v48, 0.0  ;;  %v3496_v48 = vld [vmem:[#allocation7 + $0x38] sm:$0xff]  ;;  %v672_v54 = vadd.s32 3, %v4217_v18  ;;  %2006 = vmatpush.bf16.msrb.mxu2 %v3504_v30 }
 0x13b   : > { %v4424_v10 = vunpack.c.l.b16 %v996_v41  ;;  %1937 = vmatpush.bf16.msrb.mxu1 %v3496_v48 }
 0x13c   : > { %v785_v23 = vsel %vm722_vm1, %v645_v63, 0.0  ;;  %vm686_vm4 = vcmp.ge.s32.totalorder %v672_v54, 1  ;;  %vm696_vm8 = vcmp.le.s32.totalorder %v672_v54, 16  ;;  %1589 = vmatpush.bf16.msra.mxu0 %v4340_v37 }
 0x13d   : > { %v906_v32 = vpack.c.bf16 %v785_v23, %v785_v23  ;;  %v932_v33 = vrot.slane %v785_v23, 1  ;;  %v811_v15 = vrot.slane %v785_v23, 7  ;;  %vm4457_vm9 = vmand %vm686_vm4, %vm696_vm8 }
 0x13e   : > { %v581_v16 = vpop.f32.mrf.mxu0  ;;  %vm725_vm10 = vmand %vm4457_vm9, %vm713_vm3 }
 0x13f   : > { %v582_v25 = vadd.f32 %v4213_v17, %v581_v16  ;;  %v4437_v55 = vunpack.c.l.b16 %v906_v32  ;;  %1938 = vmatpush.bf16.msrb.mxu1 %v3495_v60  ;;  %vm760_vm11 = vmand %vm4457_vm9, %vm748_vm7 }
 0x140   : > { %1590 = vmatpush.bf16.msra.mxu0 %v4350_v52  ;;  %v3479_v52 = vld [vmem:[%s4199_s22 + $0x68] sm:$0xff] }
 0x141   : > { %v646_v28 = vmax.f32 %v582_v25, 0.0 }
 0x143   : > { %v786_v53 = vsel %vm4403_vm0, %v646_v28, 0.0 }
 0x144   : > { %v942_v36 = vrot.slane %v786_v53, 1  ;;  %v907_v40 = vpack.c.bf16 %v786_v53, %v786_v53  ;;  %v821_v41 = vrot.slane %v786_v53, 7 }
 0x146   : > { %v584_v63 = vpop.f32.mrf.mxu0  ;;  %v1118_v61 = vunpack.c.l.b16 %v907_v40  ;;  %v973_v16 = vsel %vm960_vm6, %v932_v33, %v942_v36  ;;  %v852_v53 = vsel %vm839_vm5, %v811_v15, %v821_v41 }
 0x147   : > { %v585_v25 = vadd.f32 %v4213_v17, %v584_v63  ;;  %v997_v28 = vpack.c.bf16 %v973_v16, %v973_v16 }
 0x148   : > { %v4448_v11 = vpack.c.b16 %v1118_v61, %v4437_v55 }
 0x149   : > { %v647_v32 = vmax.f32 %v585_v25, 0.0  ;;  %623 = vmatmul.bf16.gmra.mxu0 %v3478_v9  ;;  %v4452_v40 = vunpack.c.l.b16 %v997_v28  ;;  %v877_v9 = vpack.c.bf16 %v852_v53, %v852_v53 }
 0x14b   : > { %v787_v23 = vsel %vm757_vm2, %v647_v32, 0.0 }
 0x14c   : > { %v831_v30 = vrot.slane %v787_v23, 7  ;;  %v952_v48 = vrot.slane %v787_v23, 1  ;;  %v908_v63 = vpack.c.bf16 %v787_v23, %v787_v23 }
 0x14e   : > { %v586_v54 = vpop.f32.mrf.mxu0  ;;  %v1119_v16 = vunpack.c.l.b16 %v908_v63  ;;  %v842_v25 = vsel %vm839_vm5, %v821_v41, %v831_v30  ;;  %v862_v28 = vsel %vm839_vm5, %v831_v30, %v811_v15  ;;  %v963_v32 = vsel %vm960_vm6, %v942_v36, %v952_v48 }
 0x14f   : > { %v587_v37 = vadd.f32 %v4213_v17, %v586_v54  ;;  %v876_v23 = vpack.c.bf16 %v862_v28, %v862_v28  ;;  %v878_v22 = vpack.c.bf16 %v842_v25, %v842_v25  ;;  %v983_v5 = vsel %vm960_vm6, %v952_v48, %v932_v33 }
 0x150   : > { %v1305_v53 = vpack.c.b16 %v1119_v16, %v1118_v61  ;;  %v998_v41 = vpack.c.bf16 %v963_v32, %v963_v32  ;;  %v999_v63 = vpack.c.bf16 %v983_v5, %v983_v5  ;;  %v1058_v30 = vunpack.c.l.b16 %v877_v9  ;;  %v3503_v32 = vld [vmem:[#allocation7 + $0x70] sm:$0xff] }
 0x151   : > { %v648_v15 = vmax.f32 %v587_v37, 0.0  ;;  %v4475_v36 = vunpack.c.l.b16 %v876_v23  ;;  %v4477_v54 = vunpack.c.l.b16 %v878_v22  ;;  %2007 = vmatpush.bf16.msrb.mxu2 %v3503_v32 }
 0x152   : > { %1601 = vmatmul.bf16.vlgmr.msra.gmra.mxu2 %v1305_v53  ;;  %v1178_v25 = vunpack.c.l.b16 %v998_v41  ;;  %v1179_v33 = vunpack.c.l.b16 %v999_v63 }
 0x153   : > { %v788_v48 = vsel %vm725_vm10, %v648_v15, 0.0  ;;  %v1304_v28 = vpack.c.b16 %v4477_v54, %v1058_v30  ;;  %v4481_v47 = vpack.c.b16 %v1058_v30, %v4475_v36 }
 0x154   : > { %v1306_v61 = vpack.c.b16 %v1179_v33, %v1178_v25  ;;  %v909_v5 = vpack.c.bf16 %v788_v48, %v788_v48  ;;  %v4485_v37 = vpack.c.b16 %v1178_v25, %v4452_v40  ;;  %v933_v15 = vrot.slane %v788_v48, 1 }
 0x155   : > { %1532 = vmatmul.bf16.vlgmr.msra.gmra.mxu1 %v1304_v28 }
 0x156   : > { %1670 = vmatmul.bf16.vlgmr.msra.gmra.mxu3 %v1306_v61  ;;  %v589_v22 = vpop.f32.mrf.mxu0  ;;  %v1120_v9 = vunpack.c.l.b16 %v909_v5  ;;  %v673_v61 = vadd.s32 4, %v4217_v18 }
 0x157   : > { %v590_v23 = vadd.f32 %v4213_v17, %v589_v22 }
 0x158   : > { %v4488_v53 = vpack.c.b16 %v1120_v9, %v1119_v16  ;;  %v812_v16 = vrot.slane %v788_v48, 7  ;;  %vm687_vm12 = vcmp.ge.s32.totalorder %v673_v61, 1  ;;  %vm697_vm13 = vcmp.le.s32.totalorder %v673_v61, 16 }
 0x159   : > { %v649_v41 = vmax.f32 %v590_v23, 0.0  ;;  %628 = vmatmul.bf16.gmra.mxu0 %v3479_v52  ;;  %vm4504_vm14 = vmand %vm687_vm12, %vm697_vm13 }
 0x15a   : > { %vm728_vm15 = vmand %vm4504_vm14, %vm713_vm3 }
 0x15b   : > { %v789_v63 = vsel %vm4457_vm9, %v649_v41, 0.0  ;;  %vm763_vm0 = vmand %vm4504_vm14, %vm748_vm7 }
 0x15c   : > { %v943_v30 = vrot.slane %v789_v63, 1  ;;  %v910_v28 = vpack.c.bf16 %v789_v63, %v789_v63  ;;  %v822_v21 = vrot.slane %v789_v63, 7 }
 0x15e   : > { %v591_v25 = vpop.f32.mrf.mxu0  ;;  %v1121_v35 = vunpack.c.l.b16 %v910_v28  ;;  %v974_v5 = vsel %vm960_vm6, %v933_v15, %v943_v30  ;;  %v853_v41 = vsel %vm839_vm5, %v812_v16, %v822_v21 }
 0x15f   : > { %v592_v32 = vadd.f32 %v4213_v17, %v591_v25  ;;  %v1000_v52 = vpack.c.bf16 %v974_v5, %v974_v5  ;;  %v880_v5 = vpack.c.bf16 %v853_v41, %v853_v41 }
 0x160   : > { %v1308_v22 = vpack.c.b16 %v1121_v35, %v1120_v9  ;;  %v3480_v9 = vld [vmem:[%s4199_s22 + $0x70] sm:$0xff] }
 0x161   : > { %v650_v23 = vmax.f32 %v592_v32, 0.0  ;;  %v1180_v63 = vunpack.c.l.b16 %v1000_v52  ;;  %v1061_v26 = vunpack.c.l.b16 %v880_v5 }
 0x162   : > { %1606 = vmatmul.bf16.gmra.mxu2 %v1308_v22 }
 0x163   : > { %v790_v60 = vsel %vm760_vm11, %v650_v23, 0.0  ;;  %v4502_v48 = vpack.c.b16 %v1180_v63, %v1179_v33 }
 0x164   : > { %v832_v28 = vrot.slane %v790_v60, 7  ;;  %v953_v25 = vrot.slane %v790_v60, 1  ;;  %v911_v20 = vpack.c.bf16 %v790_v60, %v790_v60 }
 0x166   : > { %v594_v32 = vpop.f32.mrf.mxu0  ;;  %v863_v51 = vsel %vm839_vm5, %v832_v28, %v812_v16  ;;  %v964_v52 = vsel %vm960_vm6, %v943_v30, %v953_v25  ;;  %v1122_v61 = vunpack.c.l.b16 %v911_v20  ;;  %v984_v33 = vsel %vm960_vm6, %v953_v25, %v933_v15 }
 0x167   : > { %v595_v22 = vadd.f32 %v4213_v17, %v594_v32  ;;  %v879_v23 = vpack.c.bf16 %v863_v51, %v863_v51  ;;  %v1001_v41 = vpack.c.bf16 %v964_v52, %v964_v52  ;;  %v1002_v60 = vpack.c.bf16 %v984_v33, %v984_v33 }
 0x168   : > { %v843_v16 = vsel %vm839_vm5, %v822_v21, %v832_v28  ;;  %v4522_v4 = vpack.c.b16 %v1122_v61, %v1121_v35  ;;  %v3502_v21 = vld [vmem:[#allocation7 + $0x68] sm:$0xff] }
 0x169   : > { %v651_v20 = vmax.f32 %v595_v22, 0.0  ;;  %633 = vmatmul.bf16.gmra.mxu0 %v3480_v9  ;;  %v1060_v30 = vunpack.c.l.b16 %v879_v23  ;;  %v1181_v15 = vunpack.c.l.b16 %v1001_v41  ;;  %v1182_v25 = vunpack.c.l.b16 %v1002_v60  ;;  %v3494_v35 = vld [vmem:[#allocation7 + $0x28] sm:$0xff]  ;;  %2008 = vmatpush.bf16.msrb.mxu2 %v3502_v21 }
 0x16a   : > { %5431 = vst [vmem:[#allocation28_spill] sm:$0xff] %v4522_v4  ;;  %v881_v32 = vpack.c.bf16 %v843_v16, %v843_v16  ;;  %1939 = vmatpush.bf16.msrb.mxu1 %v3494_v35 }
 0x16b   : > { %v4524_v51 = vsel %vm728_vm15, %v651_v20, 0.0  ;;  %v1307_v52 = vpack.c.b16 %v1061_v26, %v1060_v30  ;;  %v1309_v33 = vpack.c.b16 %v1181_v15, %v1180_v63  ;;  %v4527_v0 = vpack.c.b16 %v1060_v30, %v4477_v54 }
 0x16c   : > { %v912_v5 = vpack.c.bf16 %v4524_v51, %v4524_v51  ;;  %v4531_v1 = vunpack.c.l.b16 %v881_v32  ;;  %v4533_v28 = vpack.c.b16 %v1182_v25, %v1181_v15  ;;  %v934_v16 = vrot.slane %v4524_v51, 1 }
 0x16d   : > { %1537 = vmatmul.bf16.gmra.mxu1 %v1307_v52  ;;  %1675 = vmatmul.bf16.gmra.mxu3 %v1309_v33  ;;  %v813_v21 = vrot.slane %v4524_v51, 7 }
 0x16e   : > { %5432 = vst [vmem:[#allocation29_spill] sm:$0xff] %v4533_v28  ;;  %v596_v9 = vpop.f32.mrf.mxu0  ;;  %v1123_v22 = vunpack.c.l.b16 %v912_v5  ;;  %v4536_v23 = vpack.c.b16 %v4531_v1, %v1061_v26  ;;  %v3493_v28 = vld [vmem:[#allocation7 + $0x20] sm:$0xff] }
 0x16f   : > { %v597_v54 = vadd.f32 %v4213_v17, %v596_v9  ;;  %1940 = vmatpush.bf16.msrb.mxu1 %v3493_v28 }
 0x170   : > { %v1311_v63 = vpack.c.b16 %v1123_v22, %v1122_v61  ;;  %v674_v61 = vadd.s32 5, %v4217_v18 }
 0x171   : > { %v652_v41 = vmax.f32 %v597_v54, 0.0  ;;  %v5434_v54 = vpack.c.b16 %v4409_v42, %v4407_v59 }
 0x172   : > { %1611 = vmatmul.bf16.gmra.mxu2 %v1311_v63  ;;  %vm688_vm1 = vcmp.ge.s32.totalorder %v674_v61, 1  ;;  %vm698_vm2 = vcmp.le.s32.totalorder %v674_v61, 16 }
 0x173   : > { %v4541_v60 = vsel %vm4504_vm14, %v652_v41, 0.0  ;;  %vm4565_vm4 = vmand %vm688_vm1, %vm698_vm2 }
 0x174   : > { %v944_v20 = vrot.slane %v4541_v60, 1  ;;  %v913_v30 = vpack.c.bf16 %v4541_v60, %v4541_v60  ;;  %v823_v26 = vrot.slane %v4541_v60, 7  ;;  %vm731_vm8 = vmand %vm4565_vm4, %vm713_vm3 }
 0x175   : > { %vm766_vm9 = vmand %vm4565_vm4, %vm748_vm7 }
 0x176   : > { %v599_v15 = vpop.f32.mrf.mxu0  ;;  %v975_v32 = vsel %vm960_vm6, %v934_v16, %v944_v20  ;;  %v1124_v52 = vunpack.c.l.b16 %v913_v30  ;;  %v854_v41 = vsel %vm839_vm5, %v813_v21, %v823_v26 }
 0x177   : > { %v600_v33 = vadd.f32 %v4213_v17, %v599_v15  ;;  %v1003_v5 = vpack.c.bf16 %v975_v32, %v975_v32  ;;  %v883_v32 = vpack.c.bf16 %v854_v41, %v854_v41 }
 0x178   : > { %v4557_v35 = vpack.c.b16 %v1124_v52, %v1123_v22 }
 0x179   : > { %v653_v9 = vmax.f32 %v600_v33, 0.0  ;;  %1522 = vmatmul.bf16.vlgmr.msrb.gmra.mxu0 %v5434_v54  ;;  %v1183_v63 = vunpack.c.l.b16 %v1003_v5  ;;  %v3501_v33 = vld [vmem:[#allocation7 + $0x60] sm:$0xff] }
 0x17a   : > { %5433 = vst [vmem:[#allocation30_spill] sm:$0xff] %v4557_v35  ;;  %1652 = vmatpush.bf16.msrb.mxu0 %v4245_v38  ;;  %2009 = vmatpush.bf16.msrb.mxu2 %v3501_v33 }
 0x17b   : > { %v793_v51 = vsel %vm763_vm0, %v653_v9, 0.0  ;;  %v1312_v60 = vpack.c.b16 %v1183_v63, %v1182_v25 }
 0x17c   : > { %v833_v30 = vrot.slane %v793_v51, 7  ;;  %v954_v44 = vrot.slane %v793_v51, 1  ;;  %v914_v15 = vpack.c.bf16 %v793_v51, %v793_v51 }
 0x17d   : > { %1680 = vmatmul.bf16.gmra.mxu3 %v1312_v60 }
 0x17e   : > { %v601_v5 = vpop.f32.mrf.mxu0  ;;  %v1125_v54 = vunpack.c.l.b16 %v914_v15  ;;  %v864_v61 = vsel %vm839_vm5, %v833_v30, %v813_v21  ;;  %v965_v38 = vsel %vm960_vm6, %v944_v20, %v954_v44  ;;  %1653 = vmatpush.bf16.msrb.mxu0 %v4267_v50  ;;  %v985_v60 = vsel %vm960_vm6, %v954_v44, %v934_v16 }
 0x17f   : > { %v602_v25 = vadd.f32 %v4213_v17, %v601_v5  ;;  %v882_v9 = vpack.c.bf16 %v864_v61, %v864_v61  ;;  %v1004_v51 = vpack.c.bf16 %v965_v38, %v965_v38  ;;  %v1064_v20 = vunpack.c.l.b16 %v883_v32 }
 0x180   : > { %v1314_v41 = vpack.c.b16 %v1125_v54, %v1124_v52  ;;  %v1005_v33 = vpack.c.bf16 %v985_v60, %v985_v60 }
 0x181   : > { %v654_v21 = vmax.f32 %v602_v25, 0.0  ;;  %v1063_v15 = vunpack.c.l.b16 %v882_v9  ;;  %v1184_v35 = vunpack.c.l.b16 %v1004_v51 }
 0x182   : > { %1616 = vmatmul.bf16.gmra.mxu2 %v1314_v41  ;;  %1654 = vmatpush.bf16.msrb.mxu0 %v4275_v58  ;;  %v1301_v58 = vpack.c.b16 %v4475_v36, %v4411_v62  ;;  %v1185_v32 = vunpack.c.l.b16 %v1005_v33 }
 0x183   : > { %v794_v50 = vsel %vm731_vm8, %v654_v21, 0.0  ;;  %v1310_v5 = vpack.c.b16 %v1063_v15, %v4531_v1  ;;  %v4583_v61 = vpack.c.b16 %v1064_v20, %v1063_v15  ;;  %v4585_v52 = vpack.c.b16 %v1184_v35, %v1183_v63 }
 0x184   : > { %v915_v38 = vpack.c.bf16 %v794_v50, %v794_v50  ;;  %v844_v1 = vsel %vm839_vm5, %v823_v26, %v833_v30  ;;  %v1315_v63 = vpack.c.b16 %v1185_v32, %v1184_v35  ;;  %v935_v51 = vrot.slane %v794_v50, 1 }
 0x185   : > { %1542 = vmatmul.bf16.gmra.mxu1 %v1310_v5  ;;  %v675_v21 = vadd.s32 6, %v4217_v18 }
 0x186   : > { %v604_v4 = vpop.f32.mrf.mxu0  ;;  %v1126_v16 = vunpack.c.l.b16 %v915_v38  ;;  %1655 = vmatpush.bf16.msrb.mxu0 %v4298_v7  ;;  %v884_v7 = vpack.c.bf16 %v844_v1, %v844_v1  ;;  %v814_v38 = vrot.slane %v794_v50, 7 }
 0x187   : > { %v605_v44 = vadd.f32 %v4213_v17, %v604_v4  ;;  %vm689_vm10 = vcmp.ge.s32.totalorder %v675_v21, 1  ;;  %vm699_vm11 = vcmp.le.s32.totalorder %v675_v21, 16 }
 0x188   : > { %v4593_v25 = vpack.c.b16 %v1126_v16, %v1125_v54  ;;  %v1065_v30 = vunpack.c.l.b16 %v884_v7  ;;  %v3500_v7 = vld [vmem:[#allocation7 + $0x58] sm:$0xff]  ;;  %vm4610_vm12 = vmand %vm689_vm10, %vm699_vm11 }
 0x189   : > { %v655_v9 = vmax.f32 %v605_v44, 0.0  ;;  %1527 = vmatmul.bf16.gmra.mxu0 %v1301_v58  ;;  %2010 = vmatpush.bf16.msrb.mxu2 %v3500_v7  ;;  %vm734_vm13 = vmand %vm4610_vm12, %vm713_vm3  ;;  %v3544_v7 = vld [vmem:[#allocation7 + $0x1b8] sm:$0xff] }
 0x18a   : > { %1656 = vmatpush.bf16.msrb.mxu0 %v4324_v24  ;;  %v1313_v44 = vpack.c.b16 %v1065_v30, %v1064_v20  ;;  %vm769_vm14 = vmand %vm4610_vm12, %vm748_vm7 }
 0x18b   : > { %v795_v28 = vsel %vm4565_vm4, %v655_v9, 0.0 }
 0x18c   : > { %v945_v4 = vrot.slane %v795_v28, 1  ;;  %v916_v41 = vpack.c.bf16 %v795_v28, %v795_v28  ;;  %v824_v15 = vrot.slane %v795_v28, 7  ;;  %v3492_v28 = vld [vmem:[#allocation7 + $0x18] sm:$0xff] }
 0x18d   : > { %1685 = vmatmul.bf16.gmra.mxu3 %v1315_v63  ;;  %1941 = vmatpush.bf16.msrb.mxu1 %v3492_v28 }
 0x18e   : > { %v606_v36 = vpop.f32.mrf.mxu0  ;;  %v1127_v60 = vunpack.c.l.b16 %v916_v41  ;;  %v976_v26 = vsel %vm960_vm6, %v935_v51, %v945_v4  ;;  %1657 = vmatpush.bf16.msrb.mxu0 %v4336_v34 }
 0x18f   : > { %v607_v24 = vadd.f32 %v4213_v17, %v606_v36  ;;  %v1006_v54 = vpack.c.bf16 %v976_v26, %v976_v26 }
 0x190   : > { %v1317_v35 = vpack.c.b16 %v1127_v60, %v1126_v16  ;;  %v855_v16 = vsel %vm839_vm5, %v814_v38, %v824_v15 }
 0x191   : > { %v656_v5 = vmax.f32 %v607_v24, 0.0  ;;  %v1186_v33 = vunpack.c.l.b16 %v1006_v54 }
 0x192   : > { %1621 = vmatmul.bf16.gmra.mxu2 %v1317_v35  ;;  %1658 = vmatpush.bf16.msrb.mxu0 %v4348_v49 }
 0x193   : > { %v796_v34 = vsel %vm766_vm9, %v656_v5, 0.0  ;;  %v4608_v58 = vpack.c.b16 %v1186_v33, %v1185_v32 }
 0x194   : > { %v834_v1 = vrot.slane %v796_v34, 7  ;;  %v955_v9 = vrot.slane %v796_v34, 1  ;;  %v917_v63 = vpack.c.bf16 %v796_v34, %v796_v34 }
 0x195   : > { %1547 = vmatmul.bf16.gmra.mxu1 %v1313_v44 }
 0x196   : > { %v609_v41 = vpop.f32.mrf.mxu0  ;;  %v966_v49 = vsel %vm960_vm6, %v945_v4, %v955_v9  ;;  %v1128_v20 = vunpack.c.l.b16 %v917_v63  ;;  %v865_v50 = vsel %vm839_vm5, %v834_v1, %v814_v38  ;;  %v986_v32 = vsel %vm960_vm6, %v955_v9, %v935_v51  ;;  %1659 = vmatpush.bf16.msrb.mxu0 %v4369_v2 }
 0x197   : > { %v610_v36 = vadd.f32 %v4213_v17, %v609_v41  ;;  %v1007_v21 = vpack.c.bf16 %v966_v49, %v966_v49  ;;  %v885_v26 = vpack.c.bf16 %v865_v50, %v865_v50  ;;  %v1008_v24 = vpack.c.bf16 %v986_v32, %v986_v32  ;;  %v3543_v32 = vld [vmem:[#allocation7 + $0x1b0] sm:$0xff] }
 0x198   : > { %v886_v4 = vpack.c.bf16 %v855_v16, %v855_v16  ;;  %v845_v54 = vsel %vm839_vm5, %v824_v15, %v834_v1  ;;  %v4630_v35 = vpack.c.b16 %v1128_v20, %v1127_v60  ;;  %v5439_v2 = vpack.c.b16 %v4358_v57, %v4329_v27 }
 0x199   : > { %v657_v51 = vmax.f32 %v610_v36, 0.0  ;;  %v1187_v5 = vunpack.c.l.b16 %v1007_v21  ;;  %v1066_v38 = vunpack.c.l.b16 %v885_v26  ;;  %v1188_v34 = vunpack.c.l.b16 %v1008_v24  ;;  %v3542_v24 = vld [vmem:[#allocation7 + $0x1a8] sm:$0xff] }
 0x19a   : > { %1591 = vmatmul.bf16.vlgmr.msra.gmra.mxu0 %v5439_v2  ;;  %v887_v44 = vpack.c.bf16 %v845_v54, %v845_v54  ;;  %v1067_v60 = vunpack.c.l.b16 %v886_v4  ;;  %v3499_v2 = vld [vmem:[#allocation7 + $0x50] sm:$0xff] }
 0x19b   : > { %v4635_v9 = vsel %vm734_vm13, %v657_v51, 0.0  ;;  %v1318_v63 = vpack.c.b16 %v1187_v5, %v1186_v33  ;;  %v4637_v28 = vpack.c.b16 %v1066_v38, %v1065_v30  ;;  %2355 = vmatpush.bf16.msra.mxu0 %v3544_v7  ;;  %v4643_v16 = vpack.c.b16 %v1188_v34, %v1187_v5  ;;  %2011 = vmatpush.bf16.msrb.mxu2 %v3499_v2  ;;  %v3491_v2 = vld [vmem:[#allocation7 + $0x10] sm:$0xff] }
 0x19c   : > { %v918_v15 = vpack.c.bf16 %v4635_v9, %v4635_v9  ;;  %v4641_v1 = vunpack.c.l.b16 %v887_v44  ;;  %v1316_v26 = vpack.c.b16 %v1067_v60, %v1066_v38  ;;  %v936_v4 = vrot.slane %v4635_v9, 1  ;;  %1942 = vmatpush.bf16.msrb.mxu1 %v3491_v2 }
 0x19d   : > { %1690 = vmatmul.bf16.gmra.mxu3 %v1318_v63  ;;  %5440 = vst [vmem:[#allocation31_spill] sm:$0xff] %v4643_v16  ;;  %v676_v63 = vadd.s32 7, %v4217_v18 }
 0x19e   : > { %v611_v41 = vpop.f32.mrf.mxu0  ;;  %v1129_v49 = vunpack.c.l.b16 %v918_v15  ;;  %v4646_v50 = vpack.c.b16 %v4641_v1, %v1067_v60  ;;  %v1302_v15 = vpack.c.b16 %v4437_v55, %v4389_v46 }
 0x19f   : > { %v612_v33 = vadd.f32 %v4213_v17, %v611_v41  ;;  %2356 = vmatpush.bf16.msra.mxu0 %v3543_v32  ;;  %v3541_v41 = vld [vmem:[#allocation7 + $0x1a0] sm:$0xff]  ;;  %vm690_vm15 = vcmp.ge.s32.totalorder %v676_v63, 1  ;;  %vm700_vm0 = vcmp.le.s32.totalorder %v676_v63, 16 }
 0x1a0   : > { %v1320_v30 = vpack.c.b16 %v1129_v49, %v1128_v20  ;;  %vm4675_vm1 = vmand %vm690_vm15, %vm700_vm0 }
 0x1a1   : > { %v658_v36 = vmax.f32 %v612_v33, 0.0  ;;  %v815_v33 = vrot.slane %v4635_v9, 7  ;;  %vm737_vm2 = vmand %vm4675_vm1, %vm713_vm3 }
 0x1a2   : > { %1626 = vmatmul.bf16.gmra.mxu2 %v1320_v30  ;;  %vm772_vm4 = vmand %vm4675_vm1, %vm748_vm7 }
 0x1a3   : > { %v4651_v21 = vsel %vm4610_vm12, %v658_v36, 0.0  ;;  %2357 = vmatpush.bf16.msra.mxu0 %v3542_v24 }
 0x1a4   : > { %v946_v54 = vrot.slane %v4651_v21, 1  ;;  %v919_v51 = vpack.c.bf16 %v4651_v21, %v4651_v21  ;;  %v5385_v20 = vrot.slane %v4651_v21, 7 }
 0x1a5   : > { %1552 = vmatmul.bf16.gmra.mxu1 %v1316_v26  ;;  %v3540_v26 = vld [vmem:[#allocation7 + $0x198] sm:$0xff] }
 0x1a6   : > { %v614_v5 = vpop.f32.mrf.mxu0  ;;  %v977_v44 = vsel %vm960_vm6, %v936_v4, %v946_v54  ;;  %v1130_v38 = vunpack.c.l.b16 %v919_v51 }
 0x1a7   : > { %v615_v7 = vadd.f32 %v4213_v17, %v614_v5  ;;  %v1009_v60 = vpack.c.bf16 %v977_v44, %v977_v44  ;;  %v856_v17 = vsel %vm839_vm5, %v815_v33, %v5385_v20  ;;  %2358 = vmatpush.bf16.msra.mxu0 %v3541_v41 }
 0x1a8   : > { %v4669_v32 = vpack.c.b16 %v1130_v38, %v1129_v49  ;;  %v889_v5 = vpack.c.bf16 %v856_v17, %v856_v17  ;;  %v3539_v17 = vld [vmem:[#allocation7 + $0x190] sm:$0xff] }
 0x1a9   : > { %v659_v30 = vmax.f32 %v615_v7, 0.0  ;;  %v1189_v36 = vunpack.c.l.b16 %v1009_v60 }
 0x1aa   : > { %5441 = vst [vmem:[#allocation32_spill] sm:$0xff] %v4669_v32  ;;  %1596 = vmatmul.bf16.gmra.mxu0 %v1302_v15 }
 0x1ab   : > { %v799_v55 = vsel %vm769_vm14, %v659_v30, 0.0  ;;  %v1321_v9 = vpack.c.b16 %v1189_v36, %v1188_v34  ;;  %2359 = vmatpush.bf16.msra.mxu0 %v3540_v26  ;;  %v4686_v34 = vld [vmem:[%s5365_s2] ss:$0 sm:$0xff] }
 0x1ac   : > { %v835_v24 = vrot.slane %v799_v55, 7  ;;  %v956_v51 = vrot.slane %v799_v55, 1  ;;  %v920_v22 = vpack.c.bf16 %v799_v55, %v799_v55 }
 0x1ad   : > { %1695 = vmatmul.bf16.gmra.mxu3 %v1321_v9 }
 0x1ae   : > { %v616_v44 = vpop.f32.mrf.mxu0  ;;  %v1131_v63 = vunpack.c.l.b16 %v920_v22  ;;  %v866_v7 = vsel %vm839_vm5, %v835_v24, %v815_v33  ;;  %v967_v15 = vsel %vm960_vm6, %v946_v54, %v956_v51  ;;  %v987_v54 = vsel %vm960_vm6, %v956_v51, %v936_v4 }
 0x1af   : > { %v617_v60 = vadd.f32 %v4686_v34, %v616_v44  ;;  %v888_v41 = vpack.c.bf16 %v866_v7, %v866_v7  ;;  %v1010_v30 = vpack.c.bf16 %v967_v15, %v967_v15  ;;  %v1070_v22 = vunpack.c.l.b16 %v889_v5  ;;  %2360 = vmatpush.bf16.msra.mxu0 %v3539_v17  ;;  %v3538_v15 = vld [vmem:[#allocation7 + $0x188] sm:$0xff] }
 0x1b0   : > { %v1323_v33 = vpack.c.b16 %v1131_v63, %v1130_v38  ;;  %v1011_v7 = vpack.c.bf16 %v987_v54, %v987_v54  ;;  %v5447_v54 = vpack.c.b16 %v4399_v39, %v4371_v3 }
 0x1b1   : > { %v660_v55 = vmax.f32 %v617_v60, 0.0  ;;  %v1069_v9 = vunpack.c.l.b16 %v888_v41  ;;  %v1190_v26 = vunpack.c.l.b16 %v1010_v30  ;;  %v3537_v41 = vld [vmem:[#allocation7 + $0x180] sm:$0xff]  ;;  %v5445_v30 = vrot.slane %v4651_v21, 7 }
 0x1b2   : > { %1631 = vmatmul.bf16.gmra.mxu2 %v1323_v33  ;;  %v1191_v60 = vunpack.c.l.b16 %v1011_v7 }
 0x1b3   : > { %v4695_v2 = vsel %vm737_vm2, %v660_v55, 0.0  ;;  %v1319_v44 = vpack.c.b16 %v1069_v9, %v4641_v1  ;;  %v4698_v20 = vpack.c.b16 %v1070_v22, %v1069_v9  ;;  %v4702_v32 = vpack.c.b16 %v1190_v26, %v1189_v36  ;;  %2361 = vmatpush.bf16.msra.mxu0 %v3538_v15  ;;  %v3498_v15 = vld [vmem:[#allocation7 + $0x48] sm:$0xff] }
 0x1b4   : > { %v921_v38 = vpack.c.bf16 %v4695_v2, %v4695_v2  ;;  %v846_v1 = vsel %vm839_vm5, %v5445_v30, %v835_v24  ;;  %v1324_v55 = vpack.c.b16 %v1191_v60, %v1190_v26  ;;  %2012 = vmatpush.bf16.msrb.mxu2 %v3498_v15  ;;  %v816_v15 = vrot.slane %v4695_v2, 7 }
 0x1b5   : > { %1557 = vmatmul.bf16.gmra.mxu1 %v1319_v44  ;;  %5444 = vst [vmem:[#allocation33_spill] sm:$0xff] %v4702_v32  ;;  %v890_v9 = vpack.c.bf16 %v846_v1, %v846_v1  ;;  %v937_v44 = vrot.slane %v4695_v2, 1  ;;  %v3512_v1 = vld [vmem:[#allocation7 + $0xb8] sm:$0xff] }
 0x1b6   : > { %v619_v4 = vpop.f32.mrf.mxu0  ;;  %v1132_v51 = vunpack.c.l.b16 %v921_v38  ;;  %v677_v38 = vadd.s32 8, %v4217_v18  ;;  %2075 = vmatpush.bf16.msrb.mxu3 %v3512_v1 }
 0x1b7   : > { %v620_v5 = vadd.f32 %v4686_v34, %v619_v4  ;;  %2362 = vmatpush.bf16.msra.mxu0 %v3537_v41  ;;  %v1071_v30 = vunpack.c.l.b16 %v890_v9 }
 0x1b8   : > { %v4709_v17 = vpack.c.b16 %v1132_v51, %v1131_v63  ;;  %vm691_vm8 = vcmp.ge.s32.totalorder %v677_v38, 1  ;;  %vm701_vm9 = vcmp.le.s32.totalorder %v677_v38, 16 }
 0x1b9   : > { %v661_v33 = vmax.f32 %v620_v5, 0.0  ;;  %v3490_v5 = vld [vmem:[#allocation7 + $0x8] sm:$0xff]  ;;  %v1322_v9 = vpack.c.b16 %v1071_v30, %v1070_v22  ;;  %vm4728_vm10 = vmand %vm691_vm8, %vm701_vm9 }
 0x1ba   : > { %5446 = vst [vmem:[#allocation34_spill] sm:$0xff] %v4709_v17  ;;  %1660 = vmatmul.bf16.vlgmr.msrb.gmra.mxu0 %v5447_v54  ;;  %1943 = vmatpush.bf16.msrb.mxu1 %v3490_v5  ;;  %vm740_vm11 = vmand %vm4728_vm10, %vm713_vm3 }
 0x1bb   : > { %v801_v36 = vsel %vm4675_vm1, %v661_v33, 0.0  ;;  %vm775_vm12 = vmand %vm4728_vm10, %vm748_vm7 }
 0x1bc   : > { %v947_v7 = vrot.slane %v801_v36, 1  ;;  %v922_v21 = vpack.c.bf16 %v801_v36, %v801_v36  ;;  %v826_v54 = vrot.slane %v801_v36, 7 }
 0x1bd   : > { %1700 = vmatmul.bf16.gmra.mxu3 %v1324_v55 }
 0x1be   : > { %v621_v24 = vpop.f32.mrf.mxu0  ;;  %v1133_v63 = vunpack.c.l.b16 %v922_v21  ;;  %v978_v4 = vsel %vm960_vm6, %v937_v44, %v947_v7  ;;  %v857_v36 = vsel %vm839_vm5, %v816_v15, %v826_v54 }
 0x1bf   : > { %v622_v41 = vadd.f32 %v4686_v34, %v621_v24  ;;  %v1012_v26 = vpack.c.bf16 %v978_v4, %v978_v4  ;;  %v3511_v4 = vld [vmem:[#allocation7 + $0xb0] sm:$0xff] }
 0x1c0   : > { %v1326_v33 = vpack.c.b16 %v1133_v63, %v1132_v51  ;;  %2076 = vmatpush.bf16.msrb.mxu3 %v3511_v4  ;;  %v3505_v51 = vld [vmem:[#allocation7 + $0x80] sm:$0xff] }
 0x1c1   : > { %v662_v55 = vmax.f32 %v622_v41, 0.0  ;;  %v1192_v21 = vunpack.c.l.b16 %v1012_v26 }
 0x1c2   : > { %1636 = vmatmul.bf16.gmra.mxu2 %v1326_v33 }
 0x1c3   : > { %v802_v24 = vsel %vm772_vm4, %v662_v55, 0.0  ;;  %v4726_v17 = vpack.c.b16 %v1192_v21, %v1191_v60  ;;  %v3510_v55 = vld [vmem:[#allocation7 + $0xa8] sm:$0xff] }
 0x1c4   : > { %v836_v32 = vrot.slane %v802_v24, 7  ;;  %v957_v16 = vrot.slane %v802_v24, 1  ;;  %v923_v49 = vpack.c.bf16 %v802_v24, %v802_v24  ;;  %v892_v24 = vpack.c.bf16 %v857_v36, %v857_v36  ;;  %2077 = vmatpush.bf16.msrb.mxu3 %v3510_v55  ;;  %v3509_v36 = vld [vmem:[#allocation7 + $0xa0] sm:$0xff] }
 0x1c5   : > { %1562 = vmatmul.bf16.gmra.mxu1 %v1322_v9 }
 0x1c6   : > { %v624_v38 = vpop.f32.mrf.mxu0  ;;  %v968_v2 = vsel %vm960_vm6, %v947_v7, %v957_v16  ;;  %v1134_v22 = vunpack.c.l.b16 %v923_v49  ;;  %v867_v60 = vsel %vm839_vm5, %v836_v32, %v816_v15  ;;  %v988_v5 = vsel %vm960_vm6, %v957_v16, %v937_v44 }
 0x1c7   : > { %v625_v41 = vadd.f32 %v4686_v34, %v624_v38  ;;  %v1013_v26 = vpack.c.bf16 %v968_v2, %v968_v2  ;;  %v891_v1 = vpack.c.bf16 %v867_v60, %v867_v60  ;;  %v1014_v33 = vpack.c.bf16 %v988_v5, %v988_v5 }
 0x1c8   : > { %v847_v7 = vsel %vm839_vm5, %v826_v54, %v836_v32  ;;  %v4747_v9 = vpack.c.b16 %v1134_v22, %v1133_v63  ;;  %v5451_v16 = vpack.c.b16 %v4452_v40, %v4424_v10  ;;  %v1073_v63 = vunpack.c.l.b16 %v892_v24  ;;  %2078 = vmatpush.bf16.msrb.mxu3 %v3509_v36 }
 0x1c9   : > { %v663_v15 = vmax.f32 %v625_v41, 0.0  ;;  %v1193_v44 = vunpack.c.l.b16 %v1013_v26  ;;  %v1072_v4 = vunpack.c.l.b16 %v891_v1  ;;  %v4752_v49 = vunpack.c.l.b16 %v1014_v33  ;;  %v3497_v1 = vld [vmem:[#allocation7 + $0x40] sm:$0xff]  ;;  %v3508_v33 = vld [vmem:[#allocation7 + $0x98] sm:$0xff] }
 0x1ca   : > { %5450 = vst [vmem:[#allocation35_spill] sm:$0xff] %v4747_v9  ;;  %1665 = vmatmul.bf16.gmra.mxu0 %v5451_v16  ;;  %v893_v38 = vpack.c.bf16 %v847_v7, %v847_v7  ;;  %2013 = vmatpush.bf16.msrb.mxu2 %v3497_v1 }
 0x1cb   : > { %v4754_v2 = vsel %vm740_vm11, %v663_v15, 0.0  ;;  %v1327_v60 = vpack.c.b16 %v1193_v44, %v1192_v21  ;;  %v4756_v5 = vpack.c.b16 %v1072_v4, %v1071_v30  ;;  %v4763_v40 = vpack.c.b16 %v4752_v49, %v1193_v44  ;;  %v3507_v44 = vld [vmem:[#allocation7 + $0x90] sm:$0xff] }
 0x1cc   : > { %v924_v32 = vpack.c.bf16 %v4754_v2, %v4754_v2  ;;  %v4760_v54 = vunpack.c.l.b16 %v893_v38  ;;  %2079 = vmatpush.bf16.msrb.mxu3 %v3508_v33  ;;  %v1325_v16 = vpack.c.b16 %v1073_v63, %v1072_v4  ;;  %v938_v38 = vrot.slane %v4754_v2, 1 }
 0x1cd   : > { %1705 = vmatmul.bf16.gmra.mxu3 %v1327_v60  ;;  %5452 = vst [vmem:[#allocation36_spill] sm:$0xff] %v4763_v40 }
 0x1ce   : > { %v626_v41 = vpop.f32.mrf.mxu0  ;;  %v4765_v26 = vunpack.c.l.b16 %v924_v32  ;;  %v4768_v21 = vpack.c.b16 %v4760_v54, %v1073_v63  ;;  %v3489_v32 = vld [vmem:[#allocation7] sm:$0xff] }
 0x1cf   : > { %v627_v30 = vadd.f32 %v4686_v34, %v626_v41  ;;  %v678_v41 = vadd.s32 9, %v4217_v18  ;;  %1944 = vmatpush.bf16.msrb.mxu1 %v3489_v32 }
 0x1d0   : > { %5453 = vst [vmem:[#allocation37_spill] sm:$0xff] %v4765_v26  ;;  %v1329_v55 = vpack.c.b16 %v4765_v26, %v1134_v22  ;;  %2080 = vmatpush.bf16.msrb.mxu3 %v3507_v44 }
 0x1d1   : > { %v664_v24 = vmax.f32 %v627_v30, 0.0  ;;  %vm692_vm13 = vcmp.ge.s32.totalorder %v678_v41, 1  ;;  %vm702_vm14 = vcmp.le.s32.totalorder %v678_v41, 16 }
 0x1d2   : > { %1641 = vmatmul.bf16.gmra.mxu2 %v1329_v55  ;;  %v1533_v15 = vpop.f32.mrf.mxu1  ;;  %v3506_v55 = vld [vmem:[#allocation7 + $0x88] sm:$0xff]  ;;  %vm4805_vm15 = vmand %vm692_vm13, %vm702_vm14 }
 0x1d3   : > { %v4774_v7 = vsel %vm4728_vm10, %v664_v24, 0.0  ;;  %vm743_vm0 = vmand %vm4805_vm15, %vm713_vm3 }
 0x1d4   : > { %v948_v60 = vrot.slane %v4774_v7, 1  ;;  %v925_v36 = vpack.c.bf16 %v4774_v7, %v4774_v7  ;;  %v5392_v1 = vrot.slane %v4774_v7, 7  ;;  %2081 = vmatpush.bf16.msrb.mxu3 %v3506_v55  ;;  %vm778_vm3 = vmand %vm4805_vm15, %vm748_vm7 }
 0x1d5   : > { %1567 = vmatmul.bf16.gmra.mxu1 %v1325_v16  ;;  %v1602_v22 = vpop.f32.mrf.mxu2  ;;  %v817_v16 = vrot.slane %v4754_v2, 7 }
 0x1d6   : > { %v1603_v30 = vadd.f32 %v1602_v22, %v1533_v15  ;;  %v629_v33 = vpop.f32.mrf.mxu0  ;;  %v979_v4 = vsel %vm960_vm6, %v938_v38, %v948_v60  ;;  %v4784_v63 = vunpack.c.l.b16 %v925_v36 }
 0x1d7   : > { %v630_v24 = vadd.f32 %v4686_v34, %v629_v33  ;;  %v1015_v40 = vpack.c.bf16 %v979_v4, %v979_v4  ;;  %v858_v2 = vsel %vm839_vm5, %v817_v16, %v5392_v1 }
 0x1d8   : > { %5454 = vst [vmem:[#allocation38_spill] sm:$0xff] %v4784_v63  ;;  %v895_v41 = vpack.c.bf16 %v858_v2, %v858_v2  ;;  %2082 = vmatpush.bf16.msrb.mxu3 %v3505_v51 }
 0x1d9   : > { %v665_v15 = vmax.f32 %v630_v24, 0.0  ;;  %v1671_v22 = vpop.f32.mrf.mxu3  ;;  %v4795_v36 = vunpack.c.l.b16 %v1015_v40 }
 0x1da   : > { %2363 = vmatmul.bf16.vlgmr.msra.gmra.mxu0 %v4481_v47  ;;  %v4797_v44 = vadd.f32 %v1671_v22, %v1603_v30  ;;  %v1535_v40 = vpop.f32.mrf.mxu1 }
 0x1db   : > { %5455 = vst [vmem:[#allocation39_spill] sm:$0xff] %v4795_v36  ;;  %v805_v32 = vsel %vm775_vm12, %v665_v15, 0.0  ;;  %v1330_v33 = vpack.c.b16 %v4795_v36, %v4752_v49  ;;  %v5464_v36 = vpack.c.b16 %v4255_v45, %v4252_v43 }
 0x1dc   : > { %5456 = vst [vmem:[#allocation40_spill] sm:$0xff] %v4797_v44  ;;  %v837_v4 = vrot.slane %v805_v32, 7  ;;  %v958_v24 = vrot.slane %v805_v32, 1  ;;  %v926_v18 = vpack.c.bf16 %v805_v32, %v805_v32 }
 0x1dd   : > { %v1604_v26 = vpop.f32.mrf.mxu2  ;;  %1710 = vmatmul.bf16.gmra.mxu3 %v1330_v33 }
 0x1de   : > { %v1605_v22 = vadd.f32 %v1604_v26, %v1535_v40  ;;  %v631_v44 = vpop.f32.mrf.mxu0  ;;  %v4809_v1 = vunpack.c.l.b16 %v926_v18  ;;  %v868_v55 = vsel %vm839_vm5, %v837_v4, %v817_v16  ;;  %v969_v49 = vsel %vm960_vm6, %v948_v60, %v958_v24  ;;  %v3560_v16 = vld [vmem:[#allocation7 + $0x238] sm:$0xff] }
 0x1df   : > { %v632_v15 = vadd.f32 %v4686_v34, %v631_v44  ;;  %v894_v32 = vpack.c.bf16 %v868_v55, %v868_v55  ;;  %v1016_v33 = vpack.c.bf16 %v969_v49, %v969_v49  ;;  %v989_v18 = vsel %vm960_vm6, %v958_v24, %v938_v38  ;;  %2493 = vmatpush.bf16.msra.mxu2 %v3560_v16 }
 0x1e0   : > { %5459 = vst [vmem:[#allocation41_spill] sm:$0xff] %v4809_v1  ;;  %v1332_v26 = vpack.c.b16 %v4809_v1, %v4784_v63  ;;  %v4828_v44 = vunpack.c.l.b16 %v895_v41  ;;  %v1017_v63 = vpack.c.bf16 %v989_v18, %v989_v18 }
 0x1e1   : > { %v666_v2 = vmax.f32 %v632_v15, 0.0  ;;  %v1673_v40 = vpop.f32.mrf.mxu3  ;;  %v4824_v60 = vunpack.c.l.b16 %v894_v32  ;;  %v4826_v51 = vunpack.c.l.b16 %v1016_v33  ;;  %v3552_v32 = vld [vmem:[#allocation7 + $0x1f8] sm:$0xff] }
 0x1e2   : > { %v4830_v55 = vadd.f32 %v1673_v40, %v1605_v22  ;;  %1646 = vmatmul.bf16.gmra.mxu2 %v1332_v26  ;;  %v4839_v26 = vunpack.c.l.b16 %v1017_v63  ;;  %2424 = vmatpush.bf16.msra.mxu1 %v3552_v32 }
 0x1e3   : > { %v806_v49 = vsel %vm743_vm0, %v666_v2, 0.0  ;;  %v1328_v9 = vpack.c.b16 %v4824_v60, %v4760_v54  ;;  %v5462_v54 = vrot.slane %v4774_v7, 7 }
 0x1e4   : > { %v927_v41 = vpack.c.bf16 %v806_v49, %v806_v49  ;;  %5460 = vst [vmem:[#allocation42_spill] sm:$0xff] %v4839_v26  ;;  %v1333_v32 = vpack.c.b16 %v4839_v26, %v4826_v51  ;;  %v818_v7 = vrot.slane %v806_v49, 7  ;;  %v939_v24 = vrot.slane %v806_v49, 1 }
 0x1e5   : > { %1572 = vmatmul.bf16.gmra.mxu1 %v1328_v9  ;;  %v1607_v15 = vpop.f32.mrf.mxu2  ;;  %v848_v18 = vsel %vm839_vm5, %v5462_v54, %v837_v4 }
 0x1e6   : > { %v634_v33 = vpop.f32.mrf.mxu0  ;;  %v4841_v2 = vunpack.c.l.b16 %v927_v41  ;;  %v896_v41 = vpack.c.bf16 %v848_v18, %v848_v18 }
 0x1e7   : > { %v635_v22 = vadd.f32 %v4686_v34, %v634_v33 }
 0x1e8   : > { %5461 = vst [vmem:[#allocation43_spill] sm:$0xff] %v4841_v2 }
 0x1e9   : > { %v667_v16 = vmax.f32 %v635_v22, 0.0 }
 0x1ea   : > { %2368 = vmatmul.bf16.gmra.mxu0 %v4527_v0  ;;  %v1538_v40 = vpop.f32.mrf.mxu1 }
 0x1eb   : > { %v4852_v33 = vsel %vm4805_vm15, %v667_v16, 0.0  ;;  %v1608_v63 = vadd.f32 %v1607_v15, %v1538_v40  ;;  %v4863_v40 = vunpack.c.l.b16 %v896_v41 }
 0x1ec   : > { %5463 = vst [vmem:[#allocation44_spill] sm:$0xff] %v4852_v33  ;;  %v828_v4 = vrot.slane %v4852_v33, 7  ;;  %v949_v22 = vrot.slane %v4852_v33, 1 }
 0x1ed   : > { %v1609_v54 = vpop.f32.mrf.mxu2  ;;  %1715 = vmatmul.bf16.gmra.mxu3 %v1333_v32 }
 0x1ee   : > { %v636_v38 = vpop.f32.mrf.mxu0  ;;  %v859_v9 = vsel %vm839_vm5, %v818_v7, %v828_v4  ;;  %v980_v16 = vsel %vm960_vm6, %v939_v24, %v949_v22 }
 0x1ef   : > { %v637_v15 = vadd.f32 %v4686_v34, %v636_v38  ;;  %v1018_v18 = vpack.c.bf16 %v980_v16, %v980_v16  ;;  %v1331_v38 = vpack.c.b16 %v4863_v40, %v4828_v44  ;;  %v898_v41 = vpack.c.bf16 %v859_v9, %v859_v9 }
 0x1f0   : > { %v1676_v49 = vpop.f32.mrf.mxu3 }
 0x1f1   : > { %v668_v33 = vmax.f32 %v637_v15, 0.0  ;;  %v4869_v32 = vadd.f32 %v1676_v49, %v1608_v63  ;;  %v4871_v1 = vunpack.c.l.b16 %v1018_v18 }
 0x1f2   : > { %v1540_v2 = vpop.f32.mrf.mxu1  ;;  %2014 = vmatmul.bf16.vlgmr.msrb.gmra.mxu2 %v5464_v36 }
 0x1f3   : > { %v4876_v34 = vsel %vm778_vm3, %v668_v33, 0.0  ;;  %v1610_v16 = vadd.f32 %v1609_v54, %v1540_v2  ;;  %v4892_v54 = vunpack.c.l.b16 %v898_v41 }
 0x1f4   : > { %5465 = vst [vmem:[#allocation45_spill] sm:$0xff] %v4876_v34  ;;  %v838_v30 = vrot.slane %v4876_v34, 7  ;;  %v959_v63 = vrot.slane %v4876_v34, 1 }
 0x1f5   : > { %1577 = vmatmul.bf16.gmra.mxu1 %v1331_v38  ;;  %v1612_v15 = vpop.f32.mrf.mxu2 }
 0x1f6   : > { %v1523_v18 = vpop.f32.mrf.mxu0  ;;  %v869_v43 = vsel %vm839_vm5, %v838_v30, %v818_v7  ;;  %v849_v45 = vsel %vm839_vm5, %v828_v4, %v838_v30  ;;  %v970_v36 = vsel %vm960_vm6, %v949_v22, %v959_v63  ;;  %v990_v33 = vsel %vm960_vm6, %v959_v63, %v939_v24  ;;  %v3559_v7 = vld [vmem:[#allocation7 + $0x230] sm:$0xff] }
 0x1f7   : > { %v897_v49 = vpack.c.bf16 %v869_v43, %v869_v43  ;;  %v899_v29 = vpack.c.bf16 %v849_v45, %v849_v45  ;;  %v1019_v34 = vpack.c.bf16 %v970_v36, %v970_v36  ;;  %v1020_v9 = vpack.c.bf16 %v990_v33, %v990_v33  ;;  %2494 = vmatpush.bf16.msra.mxu2 %v3559_v7 }
 0x1f8   : > { %v1678_v2 = vpop.f32.mrf.mxu3  ;;  %v5467_v36 = vpack.c.b16 %v4329_v27, %v4332_v31  ;;  %v5469_v63 = vpack.c.b16 %v4371_v3, %v4374_v6 }
 0x1f9   : > { %v4894_v38 = vadd.f32 %v1678_v2, %v1610_v16  ;;  %v4897_v26 = vunpack.c.l.b16 %v897_v49  ;;  %v4899_v4 = vunpack.c.l.b16 %v899_v29  ;;  %v4901_v22 = vunpack.c.l.b16 %v1019_v34  ;;  %v3551_v29 = vld [vmem:[#allocation7 + $0x1f0] sm:$0xff] }
 0x1fa   : > { %2373 = vmatmul.bf16.gmra.mxu0 %v4536_v23  ;;  %v4903_v19 = vunpack.c.l.b16 %v1020_v9  ;;  %v5466_v16 = vpack.c.b16 %v4308_v12, %v4300_v8  ;;  %2425 = vmatpush.bf16.msra.mxu1 %v3551_v29  ;;  %v5468_v9 = vpack.c.b16 %v4312_v14, %v4310_v13  ;;  %v5470_v14 = vpack.c.b16 %v4389_v46, %v4358_v57 }
 0x1fb   : > { %v2196_v24 = vpack.c.b16 %v4897_v26, %v4863_v40  ;;  %v2199_v30 = vpack.c.b16 %v4899_v4, %v4892_v54  ;;  %v5472_v46 = vpack.c.b16 %v4424_v10, %v4399_v39  ;;  %v3557_v10 = vld [vmem:[#allocation7 + $0x220] sm:$0xff] }
 0x1fc   : > { %v3553_v40 = vld [vmem:[#allocation7 + $0x200] sm:$0xff] }
 0x1fd   : > { %v1614_v41 = vpop.f32.mrf.mxu2  ;;  %2083 = vmatmul.bf16.vlgmr.msrb.gmra.mxu3 %v5466_v16 }
 0x1fe   : > { %v1525_v34 = vpop.f32.mrf.mxu0 }
 0x200   : > { %v1681_v43 = vpop.f32.mrf.mxu3 }
 0x202   : > { %v1543_v45 = vpop.f32.mrf.mxu1  ;;  %2019 = vmatmul.bf16.gmra.mxu2 %v5467_v36 }
 0x203   : > { %v1613_v33 = vadd.f32 %v1612_v15, %v1543_v45  ;;  %v3558_v45 = vld [vmem:[#allocation7 + $0x228] sm:$0xff] }
 0x204   : > { %2495 = vmatpush.bf16.msra.mxu2 %v3558_v45 }
 0x205   : > { %v1617_v49 = vpop.f32.mrf.mxu2  ;;  %1945 = vmatmul.bf16.vlgmr.msrb.gmra.mxu1 %v5468_v9  ;;  %v4920_v2 = vadd.f32 %v1681_v43, %v1613_v33  ;;  %v3550_v33 = vld [vmem:[#allocation7 + $0x1e8] sm:$0xff] }
 0x206   : > { %v1528_v7 = vpop.f32.mrf.mxu0  ;;  %2426 = vmatpush.bf16.msra.mxu1 %v3550_v33 }
 0x208   : > { %v1683_v8 = vpop.f32.mrf.mxu3  ;;  %2496 = vmatpush.bf16.msra.mxu2 %v3557_v10 }
 0x20a   : > { %2378 = vmatmul.bf16.gmra.mxu0 %v4583_v61  ;;  %v1545_v12 = vpop.f32.mrf.mxu1 }
 0x20b   : > { %v1615_v16 = vadd.f32 %v1614_v41, %v1545_v12  ;;  %v5471_v41 = vpack.c.b16 %v4407_v59, %v4397_v56 }
 0x20d   : > { %v1619_v29 = vpop.f32.mrf.mxu2  ;;  %2088 = vmatmul.bf16.gmra.mxu3 %v5469_v63  ;;  %v4926_v27 = vadd.f32 %v1683_v8, %v1615_v16 }
 0x20e   : > { %v1530_v31 = vpop.f32.mrf.mxu0 }
 0x210   : > { %v1686_v15 = vpop.f32.mrf.mxu3 }
 0x212   : > { %v1548_v13 = vpop.f32.mrf.mxu1  ;;  %2024 = vmatmul.bf16.gmra.mxu2 %v5470_v14 }
 0x213   : > { %v1618_v43 = vadd.f32 %v1617_v49, %v1548_v13  ;;  %v5473_v13 = vpack.c.b16 %v4411_v62, %v4409_v42 }
 0x215   : > { %v1622_v36 = vpop.f32.mrf.mxu2  ;;  %1950 = vmatmul.bf16.gmra.mxu1 %v5471_v41  ;;  %v4934_v3 = vadd.f32 %v1686_v15, %v1618_v43 }
 0x217   : > { %v1592_v6 = vpop.f32.mrf.mxu0 }
 0x218   : > { %v1593_v63 = vadd.f32 %v1592_v6, %v1523_v18  ;;  %v1688_v9 = vpop.f32.mrf.mxu3 }
 0x21a   : > { %2383 = vmatmul.bf16.gmra.mxu0 %v4637_v28  ;;  %v1550_v8 = vpop.f32.mrf.mxu1 }
 0x21b   : > { %v1620_v12 = vadd.f32 %v1619_v29, %v1550_v8 }
 0x21d   : > { %v1624_v57 = vpop.f32.mrf.mxu2  ;;  %2093 = vmatmul.bf16.gmra.mxu3 %v5472_v46  ;;  %v4940_v49 = vadd.f32 %v1688_v9, %v1620_v12 }
 0x21f   : > { %v1594_v56 = vpop.f32.mrf.mxu0 }
 0x220   : > { %v1595_v59 = vadd.f32 %v1594_v56, %v1525_v34  ;;  %v1691_v16 = vpop.f32.mrf.mxu3 }
 0x222   : > { %v1553_v15 = vpop.f32.mrf.mxu1  ;;  %2029 = vmatmul.bf16.gmra.mxu2 %v4448_v11 }
 0x223   : > { %v1623_v18 = vadd.f32 %v1622_v36, %v1553_v15  ;;  %v3549_v36 = vld [vmem:[#allocation7 + $0x1e0] sm:$0xff] }
 0x224   : > { %2427 = vmatpush.bf16.msra.mxu1 %v3549_v36  ;;  %v3548_v36 = vld [vmem:[#allocation7 + $0x1d8] sm:$0xff] }
 0x225   : > { %v1627_v45 = vpop.f32.mrf.mxu2  ;;  %1955 = vmatmul.bf16.gmra.mxu1 %v5473_v13  ;;  %v4946_v29 = vadd.f32 %v1691_v16, %v1623_v18 }
 0x227   : > { %v1597_v14 = vpop.f32.mrf.mxu0 }
 0x228   : > { %v1598_v43 = vadd.f32 %v1597_v14, %v1528_v7  ;;  %v1693_v39 = vpop.f32.mrf.mxu3  ;;  %2428 = vmatpush.bf16.msra.mxu1 %v3548_v36 }
 0x22a   : > { %2388 = vmatmul.bf16.gmra.mxu0 %v4646_v50  ;;  %v1555_v41 = vpop.f32.mrf.mxu1 }
 0x22b   : > { %v1625_v34 = vadd.f32 %v1624_v57, %v1555_v41  ;;  %v5474_v41 = vld [vmem:[#allocation28_spill] sm:$0xff] }
 0x22d   : > { %v1629_v33 = vpop.f32.mrf.mxu2  ;;  %2098 = vmatmul.bf16.gmra.mxu3 %v4485_v37  ;;  %v4950_v6 = vadd.f32 %v1693_v39, %v1625_v34 }
 0x22f   : > { %v1599_v9 = vpop.f32.mrf.mxu0 }
 0x230   : > { %v1600_v42 = vadd.f32 %v1599_v9, %v1530_v31  ;;  %v1696_v62 = vpop.f32.mrf.mxu3 }
 0x232   : > { %v1558_v8 = vpop.f32.mrf.mxu1  ;;  %2034 = vmatmul.bf16.gmra.mxu2 %v4488_v53 }
 0x233   : > { %v1628_v7 = vadd.f32 %v1627_v45, %v1558_v8 }
 0x235   : > { %v1632_v12 = vpop.f32.mrf.mxu2  ;;  %1960 = vmatmul.bf16.gmra.mxu1 %v4481_v47  ;;  %v4954_v46 = vadd.f32 %v1696_v62, %v1628_v7  ;;  %v3556_v47 = vld [vmem:[#allocation7 + $0x218] sm:$0xff] }
 0x236   : > { %2497 = vmatpush.bf16.msra.mxu2 %v3556_v47 }
 0x237   : > { %v1661_v57 = vpop.f32.mrf.mxu0 }
 0x238   : > { %v4956_v56 = vadd.f32 %v1661_v57, %v1593_v63  ;;  %v1698_v16 = vpop.f32.mrf.mxu3 }
 0x23a   : > { %2393 = vmatmul.bf16.gmra.mxu0 %v4698_v20  ;;  %v1560_v15 = vpop.f32.mrf.mxu1 }
 0x23b   : > { %v1630_v18 = vadd.f32 %v1629_v33, %v1560_v15 }
 0x23d   : > { %v1634_v31 = vpop.f32.mrf.mxu2  ;;  %2103 = vmatmul.bf16.gmra.mxu3 %v4502_v48  ;;  %v4960_v13 = vadd.f32 %v1698_v16, %v1630_v18  ;;  %v5475_v16 = vld [vmem:[#allocation29_spill] sm:$0xff] }
 0x23f   : > { %v1663_v14 = vpop.f32.mrf.mxu0 }
 0x240   : > { %v4962_v45 = vadd.f32 %v1663_v14, %v1595_v59  ;;  %v1701_v39 = vpop.f32.mrf.mxu3 }
 0x242   : > { %v1563_v10 = vpop.f32.mrf.mxu1  ;;  %2039 = vmatmul.bf16.gmra.mxu2 %v5474_v41 }
 0x243   : > { %v1633_v63 = vadd.f32 %v1632_v12, %v1563_v10 }
 0x245   : > { %v1637_v34 = vpop.f32.mrf.mxu2  ;;  %1965 = vmatmul.bf16.gmra.mxu1 %v4527_v0  ;;  %v4966_v33 = vadd.f32 %v1701_v39, %v1633_v63  ;;  %v5476_v39 = vld [vmem:[#allocation30_spill] sm:$0xff] }
 0x247   : > { %v1666_v9 = vpop.f32.mrf.mxu0 }
 0x248   : > { %v4968_v62 = vadd.f32 %v1666_v9, %v1598_v43  ;;  %v1703_v8 = vpop.f32.mrf.mxu3 }
 0x24a   : > { %2398 = vmatmul.bf16.gmra.mxu0 %v4756_v5  ;;  %v1565_v59 = vpop.f32.mrf.mxu1 }
 0x24b   : > { %v1635_v7 = vadd.f32 %v1634_v31, %v1565_v59  ;;  %v3555_v31 = vld [vmem:[#allocation7 + $0x210] sm:$0xff] }
 0x24c   : > { %2498 = vmatpush.bf16.msra.mxu2 %v3555_v31 }
 0x24d   : > { %v1639_v57 = vpop.f32.mrf.mxu2  ;;  %2108 = vmatmul.bf16.gmra.mxu3 %v5475_v16  ;;  %v4972_v12 = vadd.f32 %v1703_v8, %v1635_v7 }
 0x24f   : > { %v1668_v15 = vpop.f32.mrf.mxu0 }
 0x250   : > { %v4974_v18 = vadd.f32 %v1668_v15, %v1600_v42  ;;  %v1706_v0 = vpop.f32.mrf.mxu3  ;;  %v3547_v42 = vld [vmem:[#allocation7 + $0x1d0] sm:$0xff] }
 0x251   : > { %2429 = vmatpush.bf16.msra.mxu1 %v3547_v42 }
 0x252   : > { %v1568_v14 = vpop.f32.mrf.mxu1  ;;  %2044 = vmatmul.bf16.gmra.mxu2 %v5476_v39 }
 0x253   : > { %v1638_v43 = vadd.f32 %v1637_v34, %v1568_v14 }
 0x255   : > { %v1642_v47 = vpop.f32.mrf.mxu2  ;;  %1970 = vmatmul.bf16.gmra.mxu1 %v4536_v23  ;;  %v4978_v10 = vadd.f32 %v1706_v0, %v1638_v43 }
 0x258   : > { %v1708_v63 = vpop.f32.mrf.mxu3 }
 0x25a   : > { %2403 = vmatmul.bf16.gmra.mxu0 %v4768_v21  ;;  %v1570_v36 = vpop.f32.mrf.mxu1 }
 0x25b   : > { %v1640_v9 = vadd.f32 %v1639_v57, %v1570_v36  ;;  %v5477_v57 = vpack.c.b16 %v4828_v44, %v4824_v60  ;;  %v3546_v60 = vld [vmem:[#allocation7 + $0x1c8] sm:$0xff]  ;;  %v3568_v44 = vld [vmem:[#allocation9 + $0x38] sm:$0xff] }
 0x25c   : > { %2430 = vmatpush.bf16.msra.mxu1 %v3546_v60  ;;  %2718 = vmatpush.bf16.msra.mxu3 %v3568_v44  ;;  %v5480_v60 = vld [vmem:[#allocation33_spill] sm:$0xff]  ;;  %v5481_v44 = vld [vmem:[#allocation34_spill] sm:$0xff] }
 0x25d   : > { %v1644_v8 = vpop.f32.mrf.mxu2  ;;  %2113 = vmatmul.bf16.gmra.mxu3 %v4585_v52  ;;  %v4982_v59 = vadd.f32 %v1708_v63, %v1640_v9  ;;  %v3554_v9 = vld [vmem:[#allocation7 + $0x208] sm:$0xff] }
 0x25e   : > { %2499 = vmatpush.bf16.msra.mxu2 %v3554_v9 }
 0x260   : > { %v1711_v34 = vpop.f32.mrf.mxu3 }
 0x262   : > { %v1573_v7 = vpop.f32.mrf.mxu1  ;;  %2049 = vmatmul.bf16.gmra.mxu2 %v4593_v25 }
 0x263   : > { %v1643_v23 = vadd.f32 %v1642_v47, %v1573_v7  ;;  %2500 = vmatpush.bf16.msra.mxu2 %v3553_v40 }
 0x265   : > { %v1647_v15 = vpop.f32.mrf.mxu2  ;;  %1975 = vmatmul.bf16.gmra.mxu1 %v4583_v61  ;;  %v4986_v0 = vadd.f32 %v1711_v34, %v1643_v23 }
 0x268   : > { %v1713_v14 = vpop.f32.mrf.mxu3 }
 0x26a   : > { %2408 = vmatmul.bf16.gmra.mxu0 %v5477_v57  ;;  %v1575_v43 = vpop.f32.mrf.mxu1 }
 0x26b   : > { %v1645_v31 = vadd.f32 %v1644_v8, %v1575_v43  ;;  %v5478_v43 = vld [vmem:[#allocation31_spill] sm:$0xff] }
 0x26d   : > { %v1649_v63 = vpop.f32.mrf.mxu2  ;;  %2118 = vmatmul.bf16.gmra.mxu3 %v4608_v58  ;;  %v4992_v36 = vadd.f32 %v1713_v14, %v1645_v31  ;;  %v5479_v31 = vld [vmem:[#allocation32_spill] sm:$0xff] }
 0x270   : > { %v1716_v42 = vpop.f32.mrf.mxu3 }
 0x272   : > { %v1578_v47 = vpop.f32.mrf.mxu1  ;;  %2054 = vmatmul.bf16.gmra.mxu2 %v4630_v35 }
 0x273   : > { %v1648_v61 = vadd.f32 %v1647_v15, %v1578_v47 }
 0x275   : > { %1980 = vmatmul.bf16.gmra.mxu1 %v4637_v28  ;;  %v2015_v34 = vpop.f32.mrf.mxu2  ;;  %v4996_v7 = vadd.f32 %v1716_v42, %v1648_v61 }
 0x278   : > { %v1718_v14 = vpop.f32.mrf.mxu3 }
 0x27a   : > { %2413 = vmatmul.bf16.gmra.mxu0 %v2196_v24  ;;  %v1580_v8 = vpop.f32.mrf.mxu1 }
 0x27b   : > { %v1650_v23 = vadd.f32 %v1649_v63, %v1580_v8 }
 0x27d   : > { %v2017_v57 = vpop.f32.mrf.mxu2  ;;  %2123 = vmatmul.bf16.gmra.mxu3 %v5478_v43  ;;  %v5002_v15 = vadd.f32 %v1718_v14, %v1650_v23 }
 0x282   : > { %v1946_v28 = vpop.f32.mrf.mxu1  ;;  %2059 = vmatmul.bf16.gmra.mxu2 %v5479_v31 }
 0x283   : > { %v1947_v9 = vadd.f32 %v1946_v28, %v4956_v56  ;;  %v3545_v56 = vld [vmem:[#allocation7 + $0x1c0] sm:$0xff]  ;;  %v5482_v28 = vld [vmem:[#allocation35_spill] sm:$0xff] }
 0x284   : > { %2431 = vmatpush.bf16.msra.mxu1 %v3545_v56  ;;  %v5484_v56 = vld [vmem:[#allocation36_spill] sm:$0xff] }
 0x285   : > { %v5006_v42 = vadd.f32 %v2015_v34, %v1947_v9  ;;  %1985 = vmatmul.bf16.gmra.mxu1 %v4646_v50  ;;  %v2020_v26 = vpop.f32.mrf.mxu2  ;;  %v3567_v34 = vld [vmem:[#allocation9 + $0x30] sm:$0xff]  ;;  %v5483_v9 = vld [vmem:[#allocation40_spill] sm:$0xff] }
 0x286   : > { %2719 = vmatpush.bf16.msra.mxu3 %v3567_v34 }
 0x28a   : > { %2418 = vmatmul.bf16.gmra.mxu0 %v2199_v30  ;;  %v1948_v24 = vpop.f32.mrf.mxu1 }
 0x28b   : > { %v1949_v63 = vadd.f32 %v1948_v24, %v4962_v45 }
 0x28d   : > { %v5013_v47 = vadd.f32 %v2017_v57, %v1949_v63  ;;  %v2022_v61 = vpop.f32.mrf.mxu2  ;;  %2128 = vmatmul.bf16.gmra.mxu3 %v5480_v60 }
 0x292   : > { %v1951_v50 = vpop.f32.mrf.mxu1  ;;  %2064 = vmatmul.bf16.gmra.mxu2 %v5481_v44 }
 0x293   : > { %v1952_v8 = vadd.f32 %v1951_v50, %v4968_v62 }
 0x295   : > { %v5018_v54 = vadd.f32 %v2020_v26, %v1952_v8  ;;  %1990 = vmatmul.bf16.gmra.mxu1 %v4698_v20  ;;  %v2025_v4 = vpop.f32.mrf.mxu2  ;;  %v3566_v20 = vld [vmem:[#allocation9 + $0x28] sm:$0xff] }
 0x296   : > { %2720 = vmatpush.bf16.msra.mxu3 %v3566_v20 }
 0x29a   : > { %v1953_v30 = vpop.f32.mrf.mxu1 }
 0x29b   : > { %v1954_v45 = vadd.f32 %v1953_v30, %v4974_v18 }
 0x29d   : > { %v5022_v23 = vadd.f32 %v2022_v61, %v1954_v45  ;;  %v2027_v14 = vpop.f32.mrf.mxu2  ;;  %2133 = vmatmul.bf16.gmra.mxu3 %v4726_v17 }
 0x2a2   : > { %v1956_v57 = vpop.f32.mrf.mxu1  ;;  %2069 = vmatmul.bf16.gmra.mxu2 %v5482_v28 }
 0x2a3   : > { %v1957_v40 = vadd.f32 %v1956_v57, %v5483_v9 }
 0x2a5   : > { %v5027_v24 = vadd.f32 %v2025_v4, %v1957_v40  ;;  %1995 = vmatmul.bf16.gmra.mxu1 %v4756_v5  ;;  %v2030_v62 = vpop.f32.mrf.mxu2 }
 0x2aa   : > { %v1958_v26 = vpop.f32.mrf.mxu1 }
 0x2ab   : > { %v1959_v18 = vadd.f32 %v1958_v26, %v4830_v55 }
 0x2ad   : > { %v5031_v63 = vadd.f32 %v2027_v14, %v1959_v18  ;;  %v2032_v61 = vpop.f32.mrf.mxu2  ;;  %2138 = vmatmul.bf16.gmra.mxu3 %v5484_v56  ;;  %v3565_v14 = vld [vmem:[#allocation9 + $0x20] sm:$0xff] }
 0x2ae   : > { %2721 = vmatpush.bf16.msra.mxu3 %v3565_v14  ;;  %v3563_v14 = vld [vmem:[#allocation9 + $0x10] sm:$0xff] }
 0x2b2   : > { %v1961_v34 = vpop.f32.mrf.mxu1  ;;  %2501 = vmatmul.bf16.vlgmr.msra.gmra.mxu2 %v4485_v37 }
 0x2b3   : > { %v1962_v50 = vadd.f32 %v1961_v34, %v4869_v32 }
 0x2b5   : > { %v5036_v8 = vadd.f32 %v2030_v62, %v1962_v50  ;;  %2000 = vmatmul.bf16.gmra.mxu1 %v4768_v21  ;;  %v2035_v5 = vpop.f32.mrf.mxu2 }
 0x2ba   : > { %v1963_v4 = vpop.f32.mrf.mxu1 }
 0x2bb   : > { %v1964_v30 = vadd.f32 %v1963_v4, %v4894_v38 }
 0x2bd   : > { %v5040_v45 = vadd.f32 %v2032_v61, %v1964_v30  ;;  %v2037_v55 = vpop.f32.mrf.mxu2  ;;  %v5064_v30 = vpop.f32.mrf.mxu3 }
 0x2c2   : > { %v1966_v57 = vpop.f32.mrf.mxu1  ;;  %2506 = vmatmul.bf16.gmra.mxu2 %v4502_v48 }
 0x2c3   : > { %v1967_v37 = vadd.f32 %v1966_v57, %v4920_v2  ;;  %v3564_v2 = vld [vmem:[#allocation9 + $0x18] sm:$0xff] }
 0x2c4   : > { %2722 = vmatpush.bf16.msra.mxu3 %v3564_v2 }
 0x2c5   : > { %v5044_v9 = vadd.f32 %v2035_v5, %v1967_v37  ;;  %v2040_v32 = vpop.f32.mrf.mxu2  ;;  %2432 = vmatmul.bf16.vlgmr.msra.gmra.mxu1 %v4448_v11 }
 0x2c8   : > { %2723 = vmatpush.bf16.msra.mxu3 %v3563_v14 }
 0x2ca   : > { %v1968_v21 = vpop.f32.mrf.mxu1 }
 0x2cb   : > { %v1969_v40 = vadd.f32 %v1968_v21, %v4926_v27 }
 0x2cd   : > { %v5048_v62 = vadd.f32 %v2037_v55, %v1969_v40  ;;  %v2042_v38 = vpop.f32.mrf.mxu2 }
 0x2d2   : > { %v1971_v20 = vpop.f32.mrf.mxu1  ;;  %2511 = vmatmul.bf16.gmra.mxu2 %v5475_v16 }
 0x2d3   : > { %v1972_v26 = vadd.f32 %v1971_v20, %v4934_v3 }
 0x2d5   : > { %v5052_v18 = vadd.f32 %v2040_v32, %v1972_v26  ;;  %v2045_v48 = vpop.f32.mrf.mxu2  ;;  %2437 = vmatmul.bf16.gmra.mxu1 %v4488_v53 }
 0x2da   : > { %v1973_v61 = vpop.f32.mrf.mxu1 }
 0x2db   : > { %v1974_v11 = vadd.f32 %v1973_v61, %v4940_v49 }
 0x2dd   : > { %v5056_v34 = vadd.f32 %v2042_v38, %v1974_v11  ;;  %v2047_v27 = vpop.f32.mrf.mxu2 }
 0x2e2   : > { %v1976_v50 = vpop.f32.mrf.mxu1  ;;  %2516 = vmatmul.bf16.gmra.mxu2 %v4585_v52 }
 0x2e3   : > { %v1977_v16 = vadd.f32 %v1976_v50, %v4946_v29 }
 0x2e5   : > { %v5060_v5 = vadd.f32 %v2045_v48, %v1977_v16  ;;  %v2050_v3 = vpop.f32.mrf.mxu2  ;;  %2442 = vmatmul.bf16.gmra.mxu1 %v5474_v41  ;;  %v5073_v41 = vpop.f32.mrf.mxu3 }
 0x2ea   : > { %v1978_v4 = vpop.f32.mrf.mxu1 }
 0x2eb   : > { %v1979_v53 = vadd.f32 %v1978_v4, %v4950_v6 }
 0x2ed   : > { %v5066_v55 = vadd.f32 %v2047_v27, %v1979_v53  ;;  %v2052_v49 = vpop.f32.mrf.mxu2  ;;  %v5078_v38 = vpop.f32.mrf.mxu3 }
 0x2f2   : > { %v1981_v57 = vpop.f32.mrf.mxu1  ;;  %2521 = vmatmul.bf16.gmra.mxu2 %v4608_v58 }
 0x2f3   : > { %v1982_v52 = vadd.f32 %v1981_v57, %v4954_v46 }
 0x2f5   : > { %v5070_v29 = vadd.f32 %v2050_v3, %v1982_v52  ;;  %v2055_v37 = vpop.f32.mrf.mxu2  ;;  %2447 = vmatmul.bf16.gmra.mxu1 %v5476_v39  ;;  %v3562_v39 = vld [vmem:[#allocation9 + $0x8] sm:$0xff]  ;;  %v5085_v48 = vpop.f32.mrf.mxu3 }
 0x2f6   : > { %2724 = vmatpush.bf16.msra.mxu3 %v3562_v39 }
 0x2fa   : > { %v1983_v6 = vpop.f32.mrf.mxu1 }
 0x2fb   : > { %v1984_v32 = vadd.f32 %v1983_v6, %v4960_v13 }
 0x2fd   : > { %v5076_v21 = vadd.f32 %v2052_v49, %v1984_v32  ;;  %v2057_v40 = vpop.f32.mrf.mxu2  ;;  %v5092_v50 = vpop.f32.mrf.mxu3 }
 0x302   : > { %v1986_v20 = vpop.f32.mrf.mxu1  ;;  %2526 = vmatmul.bf16.gmra.mxu2 %v5478_v43  ;;  %v2364_v43 = vpop.f32.mrf.mxu0 }
 0x303   : > { %v1987_v58 = vadd.f32 %v1986_v20, %v4966_v33 }
 0x305   : > { %v5082_v46 = vadd.f32 %v2055_v37, %v1987_v58  ;;  %v2060_v26 = vpop.f32.mrf.mxu2  ;;  %2452 = vmatmul.bf16.gmra.mxu1 %v4593_v25  ;;  %v5100_v14 = vpop.f32.mrf.mxu3 }
 0x30a   : > { %v1988_v13 = vpop.f32.mrf.mxu1 }
 0x30b   : > { %v1989_v2 = vadd.f32 %v1988_v13, %v4972_v12  ;;  %v2366_v12 = vpop.f32.mrf.mxu0 }
 0x30d   : > { %v5088_v61 = vadd.f32 %v2057_v40, %v1989_v2  ;;  %v2062_v11 = vpop.f32.mrf.mxu2 }
 0x312   : > { %v1991_v27 = vpop.f32.mrf.mxu1  ;;  %2531 = vmatmul.bf16.gmra.mxu2 %v5480_v60  ;;  %v3561_v60 = vld [vmem:[#allocation9] sm:$0xff] }
 0x313   : > { %v1992_v33 = vadd.f32 %v1991_v27, %v4978_v10  ;;  %2725 = vmatpush.bf16.msra.mxu3 %v3561_v60 }
 0x315   : > { %v5094_v16 = vadd.f32 %v2060_v26, %v1992_v33  ;;  %v2065_v25 = vpop.f32.mrf.mxu2  ;;  %2457 = vmatmul.bf16.gmra.mxu1 %v4630_v35  ;;  %v2369_v35 = vpop.f32.mrf.mxu0 }
 0x31a   : > { %v1993_v3 = vpop.f32.mrf.mxu1 }
 0x31b   : > { %v1994_v4 = vadd.f32 %v1993_v3, %v4982_v59  ;;  %v5107_v59 = vpop.f32.mrf.mxu3  ;;  %v5485_v3 = vld [vmem:[#allocation39_spill] sm:$0xff] }
 0x31d   : > { %v5098_v53 = vadd.f32 %v2062_v11, %v1994_v4  ;;  %v2067_v49 = vpop.f32.mrf.mxu2  ;;  %v2371_v58 = vpop.f32.mrf.mxu0 }
 0x322   : > { %v1996_v57 = vpop.f32.mrf.mxu1  ;;  %2536 = vmatmul.bf16.gmra.mxu2 %v4726_v17 }
 0x323   : > { %v1997_v10 = vadd.f32 %v1996_v57, %v4986_v0  ;;  %v5112_v26 = vpop.f32.mrf.mxu3 }
 0x325   : > { %v5104_v52 = vadd.f32 %v2065_v25, %v1997_v10  ;;  %v2070_v37 = vpop.f32.mrf.mxu2  ;;  %2462 = vmatmul.bf16.gmra.mxu1 %v5479_v31  ;;  %v2374_v2 = vpop.f32.mrf.mxu0 }
 0x32a   : > { %v1998_v6 = vpop.f32.mrf.mxu1 }
 0x32b   : > { %v1999_v32 = vadd.f32 %v1998_v6, %v4992_v36  ;;  %v5120_v11 = vpop.f32.mrf.mxu3 }
 0x32d   : > { %v5110_v40 = vadd.f32 %v2067_v49, %v1999_v32  ;;  %v2072_v20 = vpop.f32.mrf.mxu2  ;;  %v2376_v4 = vpop.f32.mrf.mxu0 }
 0x332   : > { %v2001_v17 = vpop.f32.mrf.mxu1  ;;  %2541 = vmatmul.bf16.gmra.mxu2 %v5484_v56  ;;  %v5486_v56 = vpack.c.b16 %v4826_v51, %v5485_v3 }
 0x333   : > { %v2002_v0 = vadd.f32 %v2001_v17, %v4996_v7  ;;  %v5128_v49 = vpop.f32.mrf.mxu3 }
 0x335   : > { %v5116_v39 = vadd.f32 %v2070_v37, %v2002_v0  ;;  %2467 = vmatmul.bf16.gmra.mxu1 %v5481_v44  ;;  %v2502_v31 = vpop.f32.mrf.mxu2  ;;  %v5135_v37 = vld [vmem:[%s5367_s4] ss:$0 sm:$0xff]  ;;  %v2379_v32 = vpop.f32.mrf.mxu0 }
 0x33a   : > { %v2003_v13 = vpop.f32.mrf.mxu1 }
 0x33b   : > { %v2004_v36 = vadd.f32 %v2003_v13, %v5002_v15  ;;  %v2085_v15 = vadd.f32 %v5064_v30, %v5006_v42  ;;  %v5140_v0 = vpop.f32.mrf.mxu3 }
 0x33d   : > { %v5122_v27 = vadd.f32 %v2072_v20, %v2004_v36  ;;  %v2504_v33 = vpop.f32.mrf.mxu2 }
 0x342   : > { %v2433_v25 = vpop.f32.mrf.mxu1  ;;  %2546 = vmatmul.bf16.gmra.mxu2 %v5486_v56 }
 0x343   : > { %v2434_v7 = vadd.f32 %v2433_v25, %v2364_v43  ;;  %v2087_v43 = vadd.f32 %v5073_v41, %v5013_v47  ;;  %v5489_v47 = vld [vmem:[#allocation38_spill] sm:$0xff]  ;;  %v5490_v41 = vld [vmem:[#allocation37_spill] sm:$0xff] }
 0x345   : > { %2472 = vmatmul.bf16.gmra.mxu1 %v5482_v28  ;;  %v2507_v44 = vpop.f32.mrf.mxu2  ;;  %v2503_v60 = vadd.f32 %v2502_v31, %v2434_v7  ;;  %v5487_v31 = vld [vmem:[#allocation42_spill] sm:$0xff] }
 0x346   : > { %v5488_v13 = vpack.c.b16 %v4871_v1, %v5487_v31 }
 0x347   : > { %v2562_v10 = vadd.f32 %v2503_v60, %v2085_v15  ;;  %v2381_v60 = vpop.f32.mrf.mxu0  ;;  %v2090_v15 = vadd.f32 %v5078_v38, %v5018_v54 }
 0x349   : > { %v2590_v20 = vadd.f32 %v5135_v37, %v2562_v10 }
 0x34a   : > { %v2435_v57 = vpop.f32.mrf.mxu1 }
 0x34b   : > { %v2436_v51 = vadd.f32 %v2435_v57, %v2366_v12  ;;  %v2614_v36 = vmax.f32 %v2590_v20, 0.0  ;;  %v5151_v57 = vpop.f32.mrf.mxu3 }
 0x34d   : > { %v2505_v6 = vadd.f32 %v2504_v33, %v2436_v51  ;;  %v2509_v28 = vpop.f32.mrf.mxu2  ;;  %v5491_v33 = vpack.c.b16 %v5489_v47, %v5490_v41 }
 0x34f   : > { %v2563_v17 = vadd.f32 %v2505_v6, %v2087_v43  ;;  %v2384_v54 = vpop.f32.mrf.mxu0 }
 0x351   : > { %v2591_v42 = vadd.f32 %v5135_v37, %v2563_v17 }
 0x352   : > { %v2438_v30 = vpop.f32.mrf.mxu1  ;;  %2551 = vmatmul.bf16.gmra.mxu2 %v5488_v13 }
 0x353   : > { %v2615_v12 = vmax.f32 %v2591_v42, 0.0  ;;  %v2439_v25 = vadd.f32 %v2438_v30, %v2369_v35  ;;  %v2092_v35 = vadd.f32 %v5085_v48, %v5022_v23  ;;  %v5492_v30 = vpack.c.b16 %v4903_v19, %v4901_v22  ;;  %v5494_v23 = vld [vmem:[#allocation41_spill] sm:$0xff]  ;;  %v5496_v22 = vld [vmem:[#allocation44_spill] sm:$0xff] }
 0x354   : > { %v928_v19 = vpack.c.bf16 %v5496_v22, %v5496_v22 }
 0x355   : > { %v2638_v3 = vpack.c.bf16 %v2615_v12, %v2614_v36  ;;  %2477 = vmatmul.bf16.gmra.mxu1 %v5491_v33  ;;  %v2512_v56 = vpop.f32.mrf.mxu2  ;;  %v2508_v7 = vadd.f32 %v2507_v44, %v2439_v25  ;;  %v5493_v36 = vld [vmem:[#allocation43_spill] sm:$0xff]  ;;  %v5497_v33 = vld [vmem:[#allocation45_spill] sm:$0xff] }
 0x356   : > { %v5495_v48 = vpack.c.b16 %v5493_v36, %v5494_v23 }
 0x357   : > { %2726 = vmatmul.bf16.vlgmr.msra.gmra.mxu3 %v2638_v3  ;;  %v2564_v1 = vadd.f32 %v2508_v7, %v2090_v15  ;;  %v2095_v3 = vadd.f32 %v5092_v50, %v5027_v24  ;;  %v929_v7 = vpack.c.bf16 %v5497_v33, %v5497_v33  ;;  %v2386_v15 = vpop.f32.mrf.mxu0 }
 0x359   : > { %v2592_v17 = vadd.f32 %v5135_v37, %v2564_v1  ;;  %v1140_v24 = vunpack.c.l.b16 %v929_v7 }
 0x35a   : > { %v2440_v10 = vpop.f32.mrf.mxu1 }
 0x35b   : > { %v2441_v51 = vadd.f32 %v2440_v10, %v2371_v58  ;;  %v2616_v31 = vmax.f32 %v2592_v17, 0.0  ;;  %v5160_v58 = vpop.f32.mrf.mxu3  ;;  %v2097_v10 = vadd.f32 %v5100_v14, %v5031_v63 }
 0x35d   : > { %v2510_v43 = vadd.f32 %v2509_v28, %v2441_v51  ;;  %v2514_v6 = vpop.f32.mrf.mxu2 }
 0x35f   : > { %v2565_v20 = vadd.f32 %v2510_v43, %v2092_v35  ;;  %v1139_v35 = vunpack.c.l.b16 %v928_v19  ;;  %v2389_v63 = vpop.f32.mrf.mxu0 }
 0x361   : > { %v2593_v44 = vadd.f32 %v5135_v37, %v2565_v20 }
 0x362   : > { %v2443_v42 = vpop.f32.mrf.mxu1  ;;  %2556 = vmatmul.bf16.gmra.mxu2 %v5492_v30 }
 0x363   : > { %v2444_v38 = vadd.f32 %v2443_v42, %v2374_v2  ;;  %v2617_v13 = vmax.f32 %v2593_v44, 0.0  ;;  %v2200_v44 = vpack.c.b16 %v1140_v24, %v1139_v35 }
 0x365   : > { %2482 = vmatmul.bf16.gmra.mxu1 %v5495_v48  ;;  %v2517_v28 = vpop.f32.mrf.mxu2  ;;  %v2639_v12 = vpack.c.bf16 %v2617_v13, %v2616_v31  ;;  %v2513_v25 = vadd.f32 %v2512_v56, %v2444_v38  ;;  %v5173_v56 = vpop.f32.mrf.mxu3  ;;  %v2100_v13 = vadd.f32 %v5107_v59, %v5036_v8 }
 0x367   : > { %2731 = vmatmul.bf16.gmra.mxu3 %v2639_v12  ;;  %v2566_v2 = vadd.f32 %v2513_v25, %v2095_v3  ;;  %v2391_v22 = vpop.f32.mrf.mxu0 }
 0x369   : > { %v2594_v50 = vadd.f32 %v5135_v37, %v2566_v2 }
 0x36a   : > { %v2445_v47 = vpop.f32.mrf.mxu1 }
 0x36b   : > { %v2446_v41 = vadd.f32 %v2445_v47, %v2376_v4  ;;  %v2618_v42 = vmax.f32 %v2594_v50, 0.0 }
 0x36d   : > { %v2515_v1 = vadd.f32 %v2514_v6, %v2446_v41  ;;  %v2519_v51 = vpop.f32.mrf.mxu2  ;;  %v5177_v6 = vpop.f32.mrf.mxu3 }
 0x36f   : > { %v2567_v43 = vadd.f32 %v2515_v1, %v2097_v10  ;;  %v2394_v10 = vpop.f32.mrf.mxu0 }
 0x371   : > { %v2595_v20 = vadd.f32 %v5135_v37, %v2567_v43  ;;  %v2107_v43 = vadd.f32 %v5128_v49, %v5048_v62  ;;  %v2110_v62 = vadd.f32 %v5140_v0, %v5052_v18 }
 0x372   : > { %v2448_v17 = vpop.f32.mrf.mxu1 }
 0x373   : > { %v2449_v4 = vadd.f32 %v2448_v17, %v2379_v32  ;;  %v2619_v30 = vmax.f32 %v2595_v20, 0.0  ;;  %v2102_v32 = vadd.f32 %v5112_v26, %v5040_v45  ;;  %v2105_v45 = vadd.f32 %v5120_v11, %v5044_v9 }
 0x375   : > { %2487 = vmatmul.bf16.gmra.mxu1 %v2200_v44  ;;  %v2522_v38 = vpop.f32.mrf.mxu2  ;;  %v2640_v31 = vpack.c.bf16 %v2619_v30, %v2618_v42  ;;  %v2518_v14 = vadd.f32 %v2517_v28, %v2449_v4  ;;  %v5185_v19 = vpop.f32.mrf.mxu3 }
 0x377   : > { %2736 = vmatmul.bf16.gmra.mxu3 %v2640_v31  ;;  %v2568_v23 = vadd.f32 %v2518_v14, %v2100_v13  ;;  %v2396_v11 = vpop.f32.mrf.mxu0 }
 0x379   : > { %v2596_v47 = vadd.f32 %v5135_v37, %v2568_v23 }
 0x37a   : > { %v2450_v36 = vpop.f32.mrf.mxu1 }
 0x37b   : > { %v2451_v48 = vadd.f32 %v2450_v36, %v2381_v60  ;;  %v2620_v33 = vmax.f32 %v2596_v47, 0.0  ;;  %v2112_v36 = vadd.f32 %v5151_v57, %v5056_v34  ;;  %v2115_v34 = vadd.f32 %v5160_v58, %v5060_v5 }
 0x37d   : > { %v2520_v12 = vadd.f32 %v2519_v51, %v2451_v48  ;;  %v2524_v25 = vpop.f32.mrf.mxu2  ;;  %v5189_v35 = vpop.f32.mrf.mxu3 }
 0x37f   : > { %v2569_v3 = vadd.f32 %v2520_v12, %v2102_v32  ;;  %v2399_v48 = vpop.f32.mrf.mxu0 }
 0x381   : > { %v2597_v28 = vadd.f32 %v5135_v37, %v2569_v3 }
 0x382   : > { %v2453_v2 = vpop.f32.mrf.mxu1 }
 0x383   : > { %v2454_v41 = vadd.f32 %v2453_v2, %v2384_v54  ;;  %v2621_v8 = vmax.f32 %v2597_v28, 0.0 }
 0x385   : > { %v2527_v59 = vpop.f32.mrf.mxu2  ;;  %v2641_v7 = vpack.c.bf16 %v2621_v8, %v2620_v33  ;;  %v2523_v60 = vadd.f32 %v2522_v38, %v2454_v41 }
 0x387   : > { %2741 = vmatmul.bf16.gmra.mxu3 %v2641_v7  ;;  %v2570_v1 = vadd.f32 %v2523_v60, %v2105_v45  ;;  %v2401_v33 = vpop.f32.mrf.mxu0  ;;  %v2117_v60 = vadd.f32 %v5173_v56, %v5066_v55  ;;  %v2120_v55 = vadd.f32 %v5177_v6, %v5070_v29 }
 0x389   : > { %v2598_v20 = vadd.f32 %v5135_v37, %v2570_v1 }
 0x38a   : > { %v2455_v26 = vpop.f32.mrf.mxu1 }
 0x38b   : > { %v2456_v51 = vadd.f32 %v2455_v26, %v2386_v15  ;;  %v2622_v42 = vmax.f32 %v2598_v20, 0.0  ;;  %v5195_v15 = vpop.f32.mrf.mxu3 }
 0x38d   : > { %v2525_v24 = vadd.f32 %v2524_v25, %v2456_v51  ;;  %v2529_v54 = vpop.f32.mrf.mxu2 }
 0x38f   : > { %v2571_v50 = vadd.f32 %v2525_v24, %v2107_v43  ;;  %v2404_v24 = vpop.f32.mrf.mxu0 }
 0x391   : > { %v2599_v17 = vadd.f32 %v5135_v37, %v2571_v50 }
 0x392   : > { %v2458_v4 = vpop.f32.mrf.mxu1 }
 0x393   : > { %v2459_v44 = vadd.f32 %v2458_v4, %v2389_v63  ;;  %v2623_v9 = vmax.f32 %v2599_v17, 0.0  ;;  %v5202_v25 = vpop.f32.mrf.mxu3 }
 0x395   : > { %v2532_v30 = vpop.f32.mrf.mxu2  ;;  %v2642_v38 = vpack.c.bf16 %v2623_v9, %v2622_v42  ;;  %v2528_v31 = vadd.f32 %v2527_v59, %v2459_v44 }
 0x397   : > { %2746 = vmatmul.bf16.gmra.mxu3 %v2642_v38  ;;  %v2572_v14 = vadd.f32 %v2528_v31, %v2110_v62  ;;  %v2406_v9 = vpop.f32.mrf.mxu0 }
 0x399   : > { %v2600_v12 = vadd.f32 %v5135_v37, %v2572_v14 }
 0x39a   : > { %v2460_v49 = vpop.f32.mrf.mxu1 }
 0x39b   : > { %v2461_v13 = vadd.f32 %v2460_v49, %v2391_v22  ;;  %v2624_v2 = vmax.f32 %v2600_v12, 0.0  ;;  %v5207_v57 = vpop.f32.mrf.mxu3 }
 0x39d   : > { %v2530_v23 = vadd.f32 %v2529_v54, %v2461_v13  ;;  %v2534_v63 = vpop.f32.mrf.mxu2 }
 0x39f   : > { %v2573_v32 = vadd.f32 %v2530_v23, %v2112_v36 }
 0x3a1   : > { %v2601_v3 = vadd.f32 %v5135_v37, %v2573_v32 }
 0x3a2   : > { %v2463_v47 = vpop.f32.mrf.mxu1 }
 0x3a3   : > { %v2464_v28 = vadd.f32 %v2463_v47, %v2394_v10  ;;  %v2625_v18 = vmax.f32 %v2601_v3, 0.0  ;;  %v5213_v58 = vpop.f32.mrf.mxu3 }
 0x3a5   : > { %v2537_v0 = vpop.f32.mrf.mxu2  ;;  %v2643_v41 = vpack.c.bf16 %v2625_v18, %v2624_v2  ;;  %v2533_v22 = vadd.f32 %v2532_v30, %v2464_v28  ;;  %v2127_v28 = vadd.f32 %v5195_v15, %v5088_v61  ;;  %v5237_v61 = vld [vmem:[%s5369_s6] ss:$0 sm:$0xff]  ;;  %v2130_v15 = vadd.f32 %v5202_v25, %v5094_v16 }
 0x3a7   : > { %2751 = vmatmul.bf16.gmra.mxu3 %v2643_v41  ;;  %v2574_v59 = vadd.f32 %v2533_v22, %v2115_v34 }
 0x3a9   : > { %v2602_v1 = vadd.f32 %v5135_v37, %v2574_v59 }
 0x3aa   : > { %v2465_v8 = vpop.f32.mrf.mxu1 }
 0x3ab   : > { %v2466_v7 = vadd.f32 %v2465_v8, %v2396_v11  ;;  %v2626_v50 = vmax.f32 %v2602_v1, 0.0  ;;  %v2122_v11 = vadd.f32 %v5185_v19, %v5076_v21  ;;  %v5219_v38 = vpop.f32.mrf.mxu3  ;;  %v2125_v21 = vadd.f32 %v5189_v35, %v5082_v46 }
 0x3ad   : > { %v2535_v45 = vadd.f32 %v2534_v63, %v2466_v7  ;;  %v2539_v26 = vpop.f32.mrf.mxu2  ;;  %v2409_v63 = vpop.f32.mrf.mxu0 }
 0x3af   : > { %v2575_v10 = vadd.f32 %v2535_v45, %v2117_v60  ;;  %v370_v60 = vld [vmem:[%s4199_s22 + $0xc] sm:$0xff]  }
 0x3b0   : > { %v2788_v16 = vunpack.c.h.bf16 %v370_v60 }
 0x3b1   : > { %v2603_v51 = vadd.f32 %v5135_v37, %v2575_v10 }
 0x3b2   : > { %v2468_v43 = vpop.f32.mrf.mxu1 }
 0x3b3   : > { %v2469_v54 = vadd.f32 %v2468_v43, %v2399_v48  ;;  %v2627_v5 = vmax.f32 %v2603_v51, 0.0  ;;  %v5223_v32 = vpop.f32.mrf.mxu3 }
 0x3b5   : > { %v2542_v20 = vpop.f32.mrf.mxu2  ;;  %v2644_v17 = vpack.c.bf16 %v2627_v5, %v2626_v50  ;;  %v2538_v4 = vadd.f32 %v2537_v0, %v2469_v54  ;;  %v2411_v41 = vpop.f32.mrf.mxu0  ;;  %v2132_v50 = vadd.f32 %v5207_v57, %v5098_v53 }
 0x3b7   : > { %2756 = vmatmul.bf16.gmra.mxu3 %v2644_v17  ;;  %v2576_v44 = vadd.f32 %v2538_v4, %v2120_v55 }
 0x3b9   : > { %v2604_v49 = vadd.f32 %v5135_v37, %v2576_v44 }
 0x3ba   : > { %v2470_v56 = vpop.f32.mrf.mxu1 }
 0x3bb   : > { %v2471_v42 = vadd.f32 %v2470_v56, %v2401_v33  ;;  %v2628_v23 = vmax.f32 %v2604_v49, 0.0  ;;  %v5231_v33 = vpop.f32.mrf.mxu3  ;;  %v372_v49 = vld [vmem:[%s4199_s22 + $0x14] sm:$0xff]  }
 0x3bd   : > { %v2540_v30 = vadd.f32 %v2539_v26, %v2471_v42  ;;  %v2544_v62 = vpop.f32.mrf.mxu2  ;;  %v2787_v26 = vunpack.c.l.bf16 %v370_v60  ;;  %v2414_v51 = vpop.f32.mrf.mxu0 }
 0x3bf   : > { %v2577_v31 = vadd.f32 %v2540_v30, %v2122_v11 }
 0x3c1   : > { %v2605_v14 = vadd.f32 %v5135_v37, %v2577_v31 }
 0x3c2   : > { %v2473_v13 = vpop.f32.mrf.mxu1 }
 0x3c3   : > { %v2474_v36 = vadd.f32 %v2473_v13, %v2404_v24  ;;  %v2629_v29 = vmax.f32 %v2605_v14, 0.0 }
 0x3c5   : > { %v2645_v6 = vpack.c.bf16 %v2629_v29, %v2628_v23  ;;  %v2543_v48 = vadd.f32 %v2542_v20, %v2474_v36  ;;  %v2547_v19 = vpop.f32.mrf.mxu2  ;;  %v2416_v57 = vpop.f32.mrf.mxu0  ;;  %v2135_v23 = vadd.f32 %v5213_v58, %v5104_v52  ;;  %v2789_v29 = vunpack.c.l.bf16 %v372_v49 }
 0x3c7   : > { %2761 = vmatmul.bf16.gmra.mxu3 %v2645_v6  ;;  %v2578_v3 = vadd.f32 %v2543_v48, %v2125_v21 }
 0x3c9   : > { %v2606_v0 = vadd.f32 %v5135_v37, %v2578_v3 }
 0x3ca   : > { %v2475_v12 = vpop.f32.mrf.mxu1 }
 0x3cb   : > { %v2476_v47 = vadd.f32 %v2475_v12, %v2406_v9  ;;  %v2630_v35 = vmax.f32 %v2606_v0, 0.0  ;;  %v2137_v12 = vadd.f32 %v5219_v38, %v5110_v40  ;;  %v2790_v0 = vunpack.c.h.bf16 %v372_v49 }
 0x3cd   : > { %v2545_v2 = vadd.f32 %v2544_v62, %v2476_v47  ;;  %v2549_v8 = vpop.f32.mrf.mxu2 }
 0x3cf   : > { %v2579_v18 = vadd.f32 %v2545_v2, %v2127_v28  ;;  %v2419_v28 = vpop.f32.mrf.mxu0 }
 0x3d1   : > { %v2607_v22 = vadd.f32 %v5135_v37, %v2579_v18 }
 0x3d2   : > { %v2478_v34 = vpop.f32.mrf.mxu1 }
 0x3d3   : > { %v2479_v46 = vadd.f32 %v2478_v34, %v2409_v63  ;;  %v2631_v59 = vmax.f32 %v2607_v22, 0.0 }
 0x3d5   : > { %v2646_v7 = vpack.c.bf16 %v2631_v59, %v2630_v35  ;;  %v2548_v45 = vadd.f32 %v2547_v19, %v2479_v46  ;;  %v2552_v5 = vpop.f32.mrf.mxu2 }
 0x3d7   : > { %2766 = vmatmul.bf16.gmra.mxu3 %v2646_v7  ;;  %v2580_v43 = vadd.f32 %v2548_v45, %v2130_v15  ;;  %v374_v7 = vld [vmem:[%s4199_s22 + $0x1c] sm:$0xff]   ;;  %v2421_v15 = vpop.f32.mrf.mxu0 }
 0x3d9   : > { %v2608_v56 = vadd.f32 %v5135_v37, %v2580_v43 }
 0x3da   : > { %v2480_v10 = vpop.f32.mrf.mxu1  ;;  %v2727_v1 = vpop.f32.mrf.mxu3 }
 0x3db   : > { %v2481_v24 = vadd.f32 %v2480_v10, %v2411_v41  ;;  %v2728_v54 = vadd.f32 %v5237_v61, %v2727_v1  ;;  %v2632_v30 = vmax.f32 %v2608_v56, 0.0  ;;  %v2791_v10 = vunpack.c.l.bf16 %v374_v7 }
 0x3dd   : > { %v2550_v20 = vadd.f32 %v2549_v8, %v2481_v24  ;;  %v2811_v17 = vadd.f32 %v2787_v26, %v2728_v54  ;;  %v2554_v14 = vpop.f32.mrf.mxu2  ;;  %v2140_v26 = vadd.f32 %v5223_v32, %v5116_v39  ;;  %v2792_v32 = vunpack.c.h.bf16 %v374_v7 }
 0x3df   : > { %v2581_v4 = vadd.f32 %v2550_v20, %v2132_v50  ;;  %v2835_v55 = vmax.f32 %v2811_v17, 0.0 }
 0x3e1   : > { %2859 = vst [vmem:[%s4197_s13] sm:$0xff] %v2835_v55  ;;  %v2609_v25 = vadd.f32 %v5135_v37, %v2581_v4 }
 0x3e2   : > { %v2483_v44 = vpop.f32.mrf.mxu1  ;;  %v2729_v42 = vpop.f32.mrf.mxu3 }
 0x3e3   : > { %v2484_v9 = vadd.f32 %v2483_v44, %v2414_v51  ;;  %v2730_v11 = vadd.f32 %v5237_v61, %v2729_v42  ;;  %v2633_v53 = vmax.f32 %v2609_v25, 0.0 }
 0x3e5   : > { %v2812_v31 = vadd.f32 %v2788_v16, %v2730_v11  ;;  %v2647_v62 = vpack.c.bf16 %v2633_v53, %v2632_v30  ;;  %v2553_v13 = vadd.f32 %v2552_v5, %v2484_v9  ;;  %v2557_v58 = vpop.f32.mrf.mxu2  ;;  %v2142_v5 = vadd.f32 %v5231_v33, %v5122_v27  ;;  %v376_v33 = vld [vmem:[%s4199_s22 + $0x24] sm:$0xff]  }
 0x3e6   : > { %v2793_v30 = vunpack.c.l.bf16 %v376_v33 }
 0x3e7   : > { %v2836_v36 = vmax.f32 %v2812_v31, 0.0  ;;  %2771 = vmatmul.bf16.gmra.mxu3 %v2647_v62  ;;  %v2582_v48 = vadd.f32 %v2553_v13, %v2135_v23  ;;  %v2794_v62 = vunpack.c.h.bf16 %v376_v33 }
 0x3e9   : > { %2860 = vst [vmem:[%s4197_s13 + $0x8] sm:$0xff] %v2836_v36  ;;  %v2610_v52 = vadd.f32 %v5135_v37, %v2582_v48  ;;  %v378_v36 = vld [vmem:[%s4199_s22 + $0x2c] sm:$0xff]  }
 0x3ea   : > { %v2485_v6 = vpop.f32.mrf.mxu1  ;;  %v2732_v63 = vpop.f32.mrf.mxu3 }
 0x3eb   : > { %v2486_v21 = vadd.f32 %v2485_v6, %v2416_v57  ;;  %v2733_v19 = vadd.f32 %v5237_v61, %v2732_v63  ;;  %v2634_v40 = vmax.f32 %v2610_v52, 0.0 }
 0x3ed   : > { %v2555_v3 = vadd.f32 %v2554_v14, %v2486_v21  ;;  %v2813_v47 = vadd.f32 %v2789_v29, %v2733_v19  ;;  %v2559_v50 = vpop.f32.mrf.mxu2  ;;  %v2795_v29 = vunpack.c.l.bf16 %v378_v36  ;;  %v2796_v19 = vunpack.c.h.bf16 %v378_v36 }
 0x3ef   : > { %v2583_v2 = vadd.f32 %v2555_v3, %v2137_v12  ;;  %v2837_v18 = vmax.f32 %v2813_v47, 0.0 }
 0x3f1   : > { %2861 = vst [vmem:[%s4197_s13 + $0x10] sm:$0xff] %v2837_v18  ;;  %v2611_v41 = vadd.f32 %v5135_v37, %v2583_v2 }
 0x3f2   : > { %v2488_v22 = vpop.f32.mrf.mxu1  ;;  %v2734_v34 = vpop.f32.mrf.mxu3 }
 0x3f3   : > { %v2489_v8 = vadd.f32 %v2488_v22, %v2419_v28  ;;  %v2735_v46 = vadd.f32 %v5237_v61, %v2734_v34  ;;  %v2635_v38 = vmax.f32 %v2611_v41, 0.0  ;;  %v380_v28 = vld [vmem:[%s4199_s22 + $0x34] sm:$0xff]  }
 0x3f4   : > { %v2797_v18 = vunpack.c.l.bf16 %v380_v28  ;;  %v2798_v22 = vunpack.c.h.bf16 %v380_v28 }
 0x3f5   : > { %v2814_v35 = vadd.f32 %v2790_v0, %v2735_v46  ;;  %v2648_v59 = vpack.c.bf16 %v2635_v38, %v2634_v40  ;;  %v2558_v60 = vadd.f32 %v2557_v58, %v2489_v8  ;;  %v382_v40 = vld [vmem:[%s4199_s22 + $0x3c] sm:$0xff]  }
 0x3f7   : > { %v2838_v45 = vmax.f32 %v2814_v35, 0.0  ;;  %2776 = vmatmul.bf16.gmra.mxu3 %v2648_v59  ;;  %v2584_v43 = vadd.f32 %v2558_v60, %v2140_v26  ;;  %v2799_v35 = vunpack.c.l.bf16 %v382_v40 }
 0x3f9   : > { %2862 = vst [vmem:[%s4197_s13 + $0x18] sm:$0xff] %v2838_v45  ;;  %v2612_v39 = vadd.f32 %v5135_v37, %v2584_v43 }
 0x3fa   : > { %v2490_v1 = vpop.f32.mrf.mxu1  ;;  %v2737_v51 = vpop.f32.mrf.mxu3 }
 0x3fb   : > { %v2491_v24 = vadd.f32 %v2490_v1, %v2421_v15  ;;  %v2738_v54 = vadd.f32 %v5237_v61, %v2737_v51  ;;  %v2636_v44 = vmax.f32 %v2612_v39, 0.0  ;;  %v2800_v15 = vunpack.c.h.bf16 %v382_v40  ;;  %v384_v51 = vld [vmem:[%s4199_s22 + $0x44] sm:$0xff]  }
 0x3fd   : > { %v2560_v20 = vadd.f32 %v2559_v50, %v2491_v24  ;;  %v2815_v17 = vadd.f32 %v2791_v10, %v2738_v54  ;;  %v2801_v24 = vunpack.c.l.bf16 %v384_v51 }
 0x3ff   : > { %v2585_v4 = vadd.f32 %v2560_v20, %v2142_v5  ;;  %v2839_v55 = vmax.f32 %v2815_v17, 0.0  ;;  %v2802_v17 = vunpack.c.h.bf16 %v384_v51 }
 0x401   : > { %2863 = vst [vmem:[%s4197_s13 + $0x20] sm:$0xff] %v2839_v55  ;;  %v2613_v56 = vadd.f32 %v5135_v37, %v2585_v4 }
 0x402   : > { %v2739_v16 = vpop.f32.mrf.mxu3 }
 0x403   : > { %v2740_v25 = vadd.f32 %v5237_v61, %v2739_v16  ;;  %v2637_v42 = vmax.f32 %v2613_v56, 0.0 }
 0x405   : > { %v2816_v9 = vadd.f32 %v2792_v32, %v2740_v25  ;;  %v2649_v27 = vpack.c.bf16 %v2637_v42, %v2636_v44  ;;  %v386_v32 = vld [vmem:[%s4199_s22 + $0x4c] sm:$0xff]  }
 0x406   : > { %v2803_v16 = vunpack.c.l.bf16 %v386_v32 }
 0x407   : > { %v2840_v11 = vmax.f32 %v2816_v9, 0.0  ;;  %2781 = vmatmul.bf16.gmra.mxu3 %v2649_v27  ;;  %v2804_v27 = vunpack.c.h.bf16 %v386_v32 }
 0x409   : > { %2864 = vst [vmem:[%s4197_s13 + $0x28] sm:$0xff] %v2840_v11 }
 0x40a   : > { %v2742_v53 = vpop.f32.mrf.mxu3 }
 0x40b   : > { %v2743_v57 = vadd.f32 %v5237_v61, %v2742_v53  ;;  %v388_v53 = vld [vmem:[%s4199_s22 + $0x54] sm:$0xff]  }
 0x40d   : > { %v2817_v37 = vadd.f32 %v2793_v30, %v2743_v57 }
 0x40f   : > { %v2841_v31 = vmax.f32 %v2817_v37, 0.0  ;;  %v2805_v37 = vunpack.c.l.bf16 %v388_v53 }
 0x411   : > { %2865 = vst [vmem:[%s4197_s13 + $0x30] sm:$0xff] %v2841_v31 }
 0x412   : > { %v2744_v49 = vpop.f32.mrf.mxu3 }
 0x413   : > { %v2745_v14 = vadd.f32 %v5237_v61, %v2744_v49 }
 0x415   : > { %v2818_v13 = vadd.f32 %v2794_v62, %v2745_v14 }
 0x417   : > { %v2842_v23 = vmax.f32 %v2818_v13, 0.0  ;;  %v2806_v13 = vunpack.c.h.bf16 %v388_v53 }
 0x419   : > { %2866 = vst [vmem:[%s4197_s13 + $0x38] sm:$0xff] %v2842_v23 }
 0x41a   : > { %v2747_v6 = vpop.f32.mrf.mxu3 }
 0x41b   : > { %v2748_v63 = vadd.f32 %v5237_v61, %v2747_v6  ;;  %v390_v6 = vld [vmem:[%s4199_s22 + $0x5c] sm:$0xff]  }
 0x41d   : > { %v2819_v48 = vadd.f32 %v2795_v29, %v2748_v63 }
 0x41f   : > { %v2843_v21 = vmax.f32 %v2819_v48, 0.0  ;;  %v2807_v48 = vunpack.c.l.bf16 %v390_v6 }
 0x421   : > { %2867 = vst [vmem:[%s4197_s13 + $0x40] sm:$0xff] %v2843_v21 }
 0x422   : > { %v2749_v12 = vpop.f32.mrf.mxu3 }
 0x423   : > { %v2750_v3 = vadd.f32 %v5237_v61, %v2749_v12 }
 0x425   : > { %v2820_v47 = vadd.f32 %v2796_v19, %v2750_v3 }
 0x427   : > { %v2844_v2 = vmax.f32 %v2820_v47, 0.0  ;;  %v2808_v47 = vunpack.c.h.bf16 %v390_v6 }
 0x429   : > { %2868 = vst [vmem:[%s4197_s13 + $0x48] sm:$0xff] %v2844_v2 }
 0x42a   : > { %v2752_v52 = vpop.f32.mrf.mxu3 }
 0x42b   : > { %v2753_v58 = vadd.f32 %v5237_v61, %v2752_v52  ;;  %v392_v52 = vld [vmem:[%s4199_s22 + $0x64] sm:$0xff]   ;;  %s5499_s22 = sand.u32 1, %s3939_s25  }
 0x42c   : > { %s2884_s30 = scalar_lea.sflag [#allocation6], %s5499_s22 }
 0x42d   : > { %v2821_v0 = vadd.f32 %v2797_v18, %v2753_v58 }
 0x42f   : > { %v2845_v41 = vmax.f32 %v2821_v0, 0.0  ;;  %v2809_v0 = vunpack.c.l.bf16 %v392_v52 }
 0x431   : > { %2869 = vst [vmem:[%s4197_s13 + $0x50] sm:$0xff] %v2845_v41 }
 0x432   : > { %v2754_v34 = vpop.f32.mrf.mxu3 }
 0x433   : > { %v2755_v8 = vadd.f32 %v5237_v61, %v2754_v34 }
 0x435   : > { %v2822_v46 = vadd.f32 %v2798_v22, %v2755_v8 }
 0x437   : > { %v2846_v38 = vmax.f32 %v2822_v46, 0.0  ;;  %v2810_v46 = vunpack.c.h.bf16 %v392_v52 }
 0x439   : > { %2870 = vst [vmem:[%s4197_s13 + $0x58] sm:$0xff] %v2846_v38 }
 0x43a   : > { %v2757_v59 = vpop.f32.mrf.mxu3 }
 0x43b   : > { %v2758_v7 = vadd.f32 %v5237_v61, %v2757_v59 }
 0x43d   : > { %v2823_v60 = vadd.f32 %v2799_v35, %v2758_v7 }
 0x43f   : > { %v2847_v45 = vmax.f32 %v2823_v60, 0.0 }
 0x441   : > { %2871 = vst [vmem:[%s4197_s13 + $0x60] sm:$0xff] %v2847_v45 }
 0x442   : > { %v2759_v26 = vpop.f32.mrf.mxu3 }
 0x443   : > { %v2760_v10 = vadd.f32 %v5237_v61, %v2759_v26 }
 0x445   : > { %v2824_v1 = vadd.f32 %v2800_v15, %v2760_v10 }
 0x447   : > { %v2848_v43 = vmax.f32 %v2824_v1, 0.0 }
 0x449   : > { %2872 = vst [vmem:[%s4197_s13 + $0x68] sm:$0xff] %v2848_v43 }
 0x44a   : > { %v2762_v54 = vpop.f32.mrf.mxu3 }
 0x44b   : > { %v2763_v50 = vadd.f32 %v5237_v61, %v2762_v54 }
 0x44d   : > { %v2825_v5 = vadd.f32 %v2801_v24, %v2763_v50 }
 0x44f   : > { %v2849_v20 = vmax.f32 %v2825_v5, 0.0 }
 0x451   : > { %2873 = vst [vmem:[%s4197_s13 + $0x70] sm:$0xff] %v2849_v20 }
 0x452   : > { %v2764_v4 = vpop.f32.mrf.mxu3 }
 0x453   : > { %v2765_v55 = vadd.f32 %v5237_v61, %v2764_v4 }
 0x455   : > { %v2826_v39 = vadd.f32 %v2802_v17, %v2765_v55 }
 0x457   : > { %v2850_v56 = vmax.f32 %v2826_v39, 0.0 }
 0x459   : > { %2874 = vst [vmem:[%s4197_s13 + $0x78] sm:$0xff] %v2850_v56 }
 0x45a   : > { %v2767_v25 = vpop.f32.mrf.mxu3 }
 0x45b   : > { %v2768_v44 = vadd.f32 %v5237_v61, %v2767_v25 }
 0x45d   : > { %v2827_v42 = vadd.f32 %v2803_v16, %v2768_v44 }
 0x45f   : > { %v2851_v9 = vmax.f32 %v2827_v42, 0.0 }
 0x461   : > { %2875 = vst [vmem:[%s4197_s13 + $0x80] sm:$0xff] %v2851_v9 }
 0x462   : > { %v2769_v33 = vpop.f32.mrf.mxu3 }
 0x463   : > { %v2770_v11 = vadd.f32 %v5237_v61, %v2769_v33 }
 0x465   : > { %v2828_v30 = vadd.f32 %v2804_v27, %v2770_v11 }
 0x467   : > { %v2852_v57 = vmax.f32 %v2828_v30, 0.0 }
 0x469   : > { %2876 = vst [vmem:[%s4197_s13 + $0x88] sm:$0xff] %v2852_v57 }
 0x46a   : > { %v2772_v31 = vpop.f32.mrf.mxu3 }
 0x46b   : > { %v2773_v62 = vadd.f32 %v5237_v61, %v2772_v31 }
 0x46d   : > { %v2829_v49 = vadd.f32 %v2805_v37, %v2773_v62 }
 0x46f   : > { %v2853_v14 = vmax.f32 %v2829_v49, 0.0 }
 0x471   : > { %2877 = vst [vmem:[%s4197_s13 + $0x90] sm:$0xff] %v2853_v14 }
 0x472   : > { %v2774_v36 = vpop.f32.mrf.mxu3 }
 0x473   : > { %v2775_v23 = vadd.f32 %v5237_v61, %v2774_v36 }
 0x475   : > { %v2830_v29 = vadd.f32 %v2806_v13, %v2775_v23 }
 0x477   : > { %v2854_v63 = vmax.f32 %v2830_v29, 0.0 }
 0x479   : > { %2878 = vst [vmem:[%s4197_s13 + $0x98] sm:$0xff] %v2854_v63 }
 0x47a   : > { %v2777_v21 = vpop.f32.mrf.mxu3 }
 0x47b   : > { %v2778_v19 = vadd.f32 %v5237_v61, %v2777_v21 }
 0x47d   : > { %v2831_v12 = vadd.f32 %v2807_v48, %v2778_v19 }
 0x47f   : > { %v2855_v3 = vmax.f32 %v2831_v12, 0.0 }
 0x481   : > { %2879 = vst [vmem:[%s4197_s13 + $0xa0] sm:$0xff] %v2855_v3 }
 0x482   : > { %v2779_v28 = vpop.f32.mrf.mxu3 }
 0x483   : > { %v2780_v2 = vadd.f32 %v5237_v61, %v2779_v28 }
 0x485   : > { %v2832_v18 = vadd.f32 %v2808_v47, %v2780_v2 }
 0x487   : > { %v2856_v58 = vmax.f32 %v2832_v18, 0.0 }
 0x489   : > { %2880 = vst [vmem:[%s4197_s13 + $0xa8] sm:$0xff] %v2856_v58 }
 0x48a   : > { %v2782_v41 = vpop.f32.mrf.mxu3 }
 0x48b   : > { %v2783_v22 = vadd.f32 %v5237_v61, %v2782_v41 }
 0x48d   : > { %v2833_v34 = vadd.f32 %v2809_v0, %v2783_v22 }
 0x48f   : > { %v2857_v8 = vmax.f32 %v2833_v34, 0.0 }
 0x491   : > { %2881 = vst [vmem:[%s4197_s13 + $0xb0] sm:$0xff] %v2857_v8 }
 0x492   : > { %v2784_v40 = vpop.f32.mrf.mxu3 }
 0x493   : > { %v2785_v38 = vadd.f32 %v5237_v61, %v2784_v40 }
 0x495   : > { %v2834_v35 = vadd.f32 %v2810_v46, %v2785_v38 }
 0x497   : > { %v2858_v59 = vmax.f32 %v2834_v35, 0.0 }
 0x499   : > { %2882 = vst [vmem:[%s4197_s13 + $0xb8] sm:$0xff] %v2858_v59 }
 0x49a   : > { %3886 = shalt.err (!%p3883_p7)
}
 0x49b   : > { %s3971_s13 = smov 128   ;;  %s3972_s21 = smov 8  }
 0x49c   : > { %3612 = dma.vmem_to_hbm [thread:$0]  (%p4065_p3), %s2900_s28, 3072, %s2902_s27, %s2884_s30, %s3971_s13, %s3971_s13, %s3972_s21  }
 0x49d PF: > { %p3636_p9 = scmp.ge.s32.totalorder %s3963_s8, 2  ;;  %s2916_s14 = sand.u32 1, %s3935_s24  }
 0x49e   : > { %p5500_p10 = scmp.ne.s32.totalorder %s5408_s16, 0  ;;  %s2917_s20 = scalar_lea.sflag [#allocation6], %s2916_s14 }
 0x4a0   : > { %p3625_p11 = pnand %p3636_p9, %p5500_p10 }
 0x4a2   : > { %p3626_p12 = pneg %p3625_p11 }
 0x4a4   : > { %3930 = dma.done.wait (%p3626_p12), %s2917_s20, 3072  }
 0x4a5   : > { %3932 = vsyncadd (%p3626_p12), %s2917_s20, 4294964224  ;;  %s22_s8 = sadd.s32 1, %s3963_s8   ;;  %s5501_s23 = sld [smem:[#allocation21_spill]] }
 0x4a6   : > { %p19_p0 = scmp.ge.s32.totalorder %s22_s8, 6   ;;  %s5502_s26 = sld [smem:[#allocation26_spill]] }
 0x4a7   : > { %s5503_s27 = sld [smem:[#allocation22_spill]]  ;;  %s5507_s24 = smov %s3939_s25 }
 0x4a8   : > { %s5504_s28 = sld [smem:[#allocation23_spill]]  ;;  %21 = sbr.rel (!%p19_p0) target bundleno = 9 (0x9), region = 114 }
 0x4a9   : > { %s5505_s29 = sld [smem:[#allocation24_spill]] }
 0x4aa   : > { %s5506_s30 = sld [smem:[#allocation25_spill]] }
 0x4ab   : > { %s5508_s25 = smov %s5501_s23 }
 0x4ad   :  { %2923 = vsyncpa [#allocation5], 1 }
 0x4ae   :  { %2925 = vsyncpa [#allocation5 + $0x1], 1 }
 0x4af   :  { %2926 = vsyncpa [#allocation8], 1 }
 0x4b0   :  { %2927 = vsyncpa [#allocation6], 1 }
 0x4b1   :  { %2929 = vsyncpa [#allocation6 + $0x1], 1 }
 0x4b2   :  { %2930 = vsyncmov [#allocation3] }
 0x4b5   :  { %s2931_s15 = vpop.sfrf %2930 }
 0x4b6   :  { %p3461_p3 = scmp.ne.s32.totalorder %s2931_s15, 0 }
 0x4b8   :  { %2935 = shalt.err (%p3461_p3)  }
 0x4b9   :  { %2937 = vsyncmov [#allocation3 + $0x1] }
 0x4bc   :  { %s2938_s16 = vpop.sfrf %2937 }
 0x4bd   :  { %p3462_p1 = scmp.ne.s32.totalorder %s2938_s16, 0 }
 0x4bf   :  { %2942 = shalt.err (%p3462_p1)  }

</bundles_post_ra>
